<compile_context>
chip_gen: v7x
topology: tpu7x:2x2x1
jax: 0.10.0
libtpu: 0.0.40
codegen_flags: <defaults>
</compile_context>

<pallas_src>
import functools

import numpy as np
import jax
import jax.numpy as jnp
from jax import lax
from jax.experimental import pallas as pl
from jax.experimental.pallas import tpu as pltpu


def _sigmoid(v):
    # exact sigmoid; reciprocal (EUP) instead of a VPU divide
    return pl.reciprocal(1.0 + jnp.exp(-v), approx=False)


def _skip_gate_kernel(xs_ref, xu_ref, wa_ref, ba_ref, w1_ref, b1_ref,
                      w2_ref, b2_ref, w7s_ref, w7u_ref, b7_ref, mask_ref,
                      out_ref, taps_ref, *, H, W):
    HW = H * W
    xs = xs_ref[...]                                   # (C, HW) channel-major
    xu = xu_ref[...]                                   # (C, HW)

    # ---- align_conv: 1x1 conv (C -> C) + bias == (C,C)@(C,HW) on the MXU
    yu = (jnp.dot(wa_ref[...], xu, preferred_element_type=jnp.float32)
          + ba_ref[...])                               # (C, HW)

    # ---- channel attention: GAP -> 1x1 -> ReLU -> 1x1 -> sigmoid
    pooled = jnp.mean(xs + yu, axis=1, keepdims=True)  # (C, 1)  lane reduce
    h1 = jnp.maximum(
        jnp.dot(w1_ref[...], pooled, preferred_element_type=jnp.float32)
        + b1_ref[...], 0.0)                            # (Cr, 1)
    ca = _sigmoid(
        jnp.dot(w2_ref[...], h1, preferred_element_type=jnp.float32)
        + b2_ref[...])                                 # (C, 1)

    # ---- spatial attention: 7x7 conv (2C -> 1, pad=3) + sigmoid
    # Channel reduction of all 49 taps in one MXU pass per input half; the
    # channel concat is never materialized.  taps[t] holds the per-pixel
    # channel-reduced plane for tap t = ky*7 + kx, flattened over (H, W).
    taps = (jnp.dot(w7s_ref[...], xs, preferred_element_type=jnp.float32)
            + jnp.dot(w7u_ref[...], yu, preferred_element_type=jnp.float32))
    # Fold the zero-padding validity masks (precomputed on host, already
    # rolled into tap-source space) with one bulk multiply, then park the
    # result in VMEM so the 49 row reads below don't keep the slab live.
    taps_ref[...] = taps * mask_ref[...]               # (49, HW)

    # 49 static lane rolls (XLU) + adds (VPU), fully unrolled; per-ky partial
    # accumulators keep the add dependency chain short.
    partials = []
    for ky in range(7):
        part = None
        for kx in range(7):
            t = ky * 7 + kx
            shift = ((3 - ky) * W + (3 - kx)) % HW
            row = taps_ref[pl.ds(t, 1), :]             # (1, HW)
            r = pltpu.roll(row, shift, axis=1)
            part = r if part is None else part + r
        partials.append(part)
    sa_pre = ((partials[0] + partials[1]) + (partials[2] + partials[3])
              + ((partials[4] + partials[5]) + partials[6]))
    sa = _sigmoid(sa_pre + b7_ref[...])                # (1, HW)

    # ---- gate + combine; fully lane-dense (last dim HW is a multiple of 128)
    out_ref[...] = xs * ca + yu * sa                   # (C, HW)


def skip_gate(x_skip_nchw, x_up_nchw, wa, ba, w1, b1, w2, b2, w7, b7):
    """Inputs in PyTorch NCHW / OIHW layouts; returns NCHW float32."""
    N, C, H, W = x_skip_nchw.shape
    Cr = w1.shape[0]            # C // 16
    HW = H * W

    # channel-major per sample: just a reshape of NCHW, no transpose needed
    xs = x_skip_nchw.reshape(N, C, HW).astype(jnp.float32)
    xu = x_up_nchw.reshape(N, C, HW).astype(jnp.float32)

    # repack PyTorch-layout weights for the kernel
    wa_k = wa[:, :, 0, 0].astype(jnp.float32)                     # (C, C)
    ba_k = ba.reshape(C, 1).astype(jnp.float32)
    w1_k = w1[:, :, 0, 0].astype(jnp.float32)                     # (Cr, C)
    b1_k = b1.reshape(Cr, 1).astype(jnp.float32)
    w2_k = w2[:, :, 0, 0].astype(jnp.float32)                     # (C, Cr)
    b2_k = b2.reshape(C, 1).astype(jnp.float32)
    # 7x7 weights split into the x_skip / x_up halves, laid out (49, C)
    w7s_k = jnp.transpose(w7[0, :C].reshape(C, 49), (1, 0)).astype(jnp.float32)
    w7u_k = jnp.transpose(w7[0, C:].reshape(C, 49), (1, 0)).astype(jnp.float32)
    b7_k = b7.reshape(1, 1).astype(jnp.float32)

    # Per-tap zero-padding validity masks, pre-rolled into tap-source space so
    # the kernel only needs one bulk multiply (no per-tap where/and).
    p = np.arange(HW)
    hh, ww = p // W, p % W
    mask = np.zeros((49, HW), np.float32)
    for ky in range(7):
        for kx in range(7):
            t = ky * 7 + kx
            m_out = ((hh + ky - 3 >= 0) & (hh + ky - 3 < H) &
                     (ww + kx - 3 >= 0) & (ww + kx - 3 < W)).astype(np.float32)
            shift = ((3 - ky) * W + (3 - kx)) % HW
            mask[t] = np.roll(m_out, -shift)
    mask = jnp.asarray(mask)

    def full(shape):
        nd = len(shape)
        return pl.BlockSpec(shape, lambda n: (0,) * nd)

    kernel = functools.partial(_skip_gate_kernel, H=H, W=W)

    out = pl.pallas_call(
        kernel,
        out_shape=jax.ShapeDtypeStruct((N, C, HW), jnp.float32),
        grid=(N,),
        in_specs=[
            pl.BlockSpec((None, C, HW), lambda n: (n, 0, 0)),     # x_skip
            pl.BlockSpec((None, C, HW), lambda n: (n, 0, 0)),     # x_up
            full((C, C)), full((C, 1)),                           # align conv
            full((Cr, C)), full((Cr, 1)),                         # SE fc1
            full((C, Cr)), full((C, 1)),                          # SE fc2
            full((49, C)), full((49, C)),                         # 7x7 weights
            full((1, 1)),                                         # 7x7 bias
            full((49, HW)),                                       # tap masks
        ],
        out_specs=pl.BlockSpec((None, C, HW), lambda n: (n, 0, 0)),
        scratch_shapes=[pltpu.VMEM((49, HW), jnp.float32)],
        compiler_params=pltpu.CompilerParams(
            dimension_semantics=("parallel",)),
    )(xs, xu, wa_k, ba_k, w1_k, b1_k, w2_k, b2_k, w7s_k, w7u_k, b7_k, mask)

    return out.reshape(N, C, H, W)


def reference(x_skip, x_up, wa, ba, w1, b1, w2, b2, w7, b7):
    """Pure-JAX reference matching the PyTorch SkipGate forward."""
    dn = ('NCHW', 'OIHW', 'NCHW')

    def conv(x, w, b, pad):
        y = lax.conv_general_dilated(x, w, (1, 1), [(pad, pad), (pad, pad)],
                                     dimension_numbers=dn)
        return y + b.reshape(1, -1, 1, 1)

    xu = conv(x_up, wa, ba, 0)                                    # align_conv
    pooled = jnp.mean(x_skip + xu, axis=(2, 3), keepdims=True)
    h = jnp.maximum(conv(pooled, w1, b1, 0), 0.0)
    ca = jax.nn.sigmoid(conv(h, w2, b2, 0))
    cat = jnp.concatenate([x_skip, xu], axis=1)
    sa = jax.nn.sigmoid(conv(cat, w7, b7, 3))
    return x_skip * ca + xu * sa


if __name__ == "__main__":
    # channels must be >= 16 so that channels // 16 >= 1 (as in the module)
    N, C, H, W = 2, 32, 16, 16
    Cr = C // 16

    key = jax.random.PRNGKey(0)
    ks = jax.random.split(key, 10)

    x_skip = jax.random.normal(ks[0], (N, C, H, W), jnp.float32)
    x_up = jax.random.normal(ks[1], (N, C, H, W), jnp.float32)

    # deterministic synthetic parameters (PyTorch weight layouts)
    wa = 0.20 * jax.random.normal(ks[2], (C, C, 1, 1), jnp.float32)      # align
    ba = 0.10 * jax.random.normal(ks[3], (C,), jnp.float32)
    w1 = 0.30 * jax.random.normal(ks[4], (Cr, C, 1, 1), jnp.float32)     # SE fc1
    b1 = 0.10 * jax.random.normal(ks[5], (Cr,), jnp.float32)
    w2 = 0.30 * jax.random.normal(ks[6], (C, Cr, 1, 1), jnp.float32)     # SE fc2
    b2 = 0.10 * jax.random.normal(ks[7], (C,), jnp.float32)
    w7 = 0.05 * jax.random.normal(ks[8], (1, 2 * C, 7, 7), jnp.float32)  # spatial
    b7 = 0.10 * jax.random.normal(ks[9], (1,), jnp.float32)

    out = skip_gate(x_skip, x_up, wa, ba, w1, b1, w2, b2, w7, b7)
    out = jax.block_until_ready(out)

    ref = reference(x_skip, x_up, wa, ba, w1, b1, w2, b2, w7, b7)
    assert out.shape == (N, C, H, W)
    err = jnp.max(jnp.abs(out - ref))
    assert jnp.allclose(out, ref, atol=1e-3, rtol=1e-3), f"max err {err}"

    print("KERNEL_OK")
</pallas_src>

<mosaic_0001>
module attributes {stable_mosaic.version = 11 : i64} {
  func.func @_skip_gate_kernel(%arg0: i32, %arg1: memref<1x32x256xf32, #tpu.memory_space<vmem>>, %arg2: memref<1x32x256xf32, #tpu.memory_space<vmem>>, %arg3: memref<32x32xf32, #tpu.memory_space<vmem>>, %arg4: memref<32x1xf32, #tpu.memory_space<vmem>>, %arg5: memref<2x32xf32, #tpu.memory_space<vmem>>, %arg6: memref<2x1xf32, #tpu.memory_space<vmem>>, %arg7: memref<32x2xf32, #tpu.memory_space<vmem>>, %arg8: memref<32x1xf32, #tpu.memory_space<vmem>>, %arg9: memref<49x32xf32, #tpu.memory_space<vmem>>, %arg10: memref<49x32xf32, #tpu.memory_space<vmem>>, %arg11: memref<1x1xf32, #tpu.memory_space<vmem>>, %arg12: memref<49x256xf32, #tpu.memory_space<vmem>>, %arg13: memref<1x32x256xf32, #tpu.memory_space<vmem>>, %arg14: memref<49x256xf32, #tpu.memory_space<vmem>>) attributes {dimension_semantics = [#tpu.dimension_semantics<parallel>], iteration_bounds = array<i64: 2>, scalar_prefetch = 0 : i64, scratch_operands = 1 : i64, tpu.core_type = #tpu.core_type<tc>, window_params = [{transform_indices = @transform_0, window_bounds = array<i64: 1, 32, 256>}, {transform_indices = @transform_1, window_bounds = array<i64: 1, 32, 256>}, {pipeline_mode = #tpu.pipeline_mode<synchronous>, transform_indices = @transform_2, window_bounds = array<i64: 32, 32>}, {pipeline_mode = #tpu.pipeline_mode<synchronous>, transform_indices = @transform_3, window_bounds = array<i64: 32, 1>}, {pipeline_mode = #tpu.pipeline_mode<synchronous>, transform_indices = @transform_4, window_bounds = array<i64: 2, 32>}, {pipeline_mode = #tpu.pipeline_mode<synchronous>, transform_indices = @transform_5, window_bounds = array<i64: 2, 1>}, {pipeline_mode = #tpu.pipeline_mode<synchronous>, transform_indices = @transform_6, window_bounds = array<i64: 32, 2>}, {pipeline_mode = #tpu.pipeline_mode<synchronous>, transform_indices = @transform_7, window_bounds = array<i64: 32, 1>}, {pipeline_mode = #tpu.pipeline_mode<synchronous>, transform_indices = @transform_8, window_bounds = array<i64: 49, 32>}, {pipeline_mode = #tpu.pipeline_mode<synchronous>, transform_indices = @transform_9, window_bounds = array<i64: 49, 32>}, {pipeline_mode = #tpu.pipeline_mode<synchronous>, transform_indices = @transform_10, window_bounds = array<i64: 1, 1>}, {pipeline_mode = #tpu.pipeline_mode<synchronous>, transform_indices = @transform_11, window_bounds = array<i64: 49, 256>}, {transform_indices = @transform_12, window_bounds = array<i64: 1, 32, 256>}]} {
    %c0 = arith.constant 0 : index
    %c0_0 = arith.constant 0 : index
    %c0_1 = arith.constant 0 : index
    %0 = vector.load %arg1[%c0, %c0_0, %c0_1] : memref<1x32x256xf32, #tpu.memory_space<vmem>>, vector<1x32x256xf32>
    %1 = vector.shape_cast %0 : vector<1x32x256xf32> to vector<32x256xf32>
    %c0_2 = arith.constant 0 : index
    %c0_3 = arith.constant 0 : index
    %c0_4 = arith.constant 0 : index
    %2 = vector.load %arg2[%c0_2, %c0_3, %c0_4] : memref<1x32x256xf32, #tpu.memory_space<vmem>>, vector<1x32x256xf32>
    %3 = vector.shape_cast %2 : vector<1x32x256xf32> to vector<32x256xf32>
    %c0_5 = arith.constant 0 : index
    %c0_6 = arith.constant 0 : index
    %4 = vector.load %arg3[%c0_5, %c0_6] : memref<32x32xf32, #tpu.memory_space<vmem>>, vector<32x32xf32>
    %cst = arith.constant dense<0.000000e+00> : vector<32x256xf32>
    %5 = tpu.matmul %4, %3, %cst {dimension_numbers = #tpu.dot_dimension_numbers<[1], [0], [0], [1], [0, 0, 1, 1], [], []>} : vector<32x32xf32>, vector<32x256xf32>, vector<32x256xf32> -> vector<32x256xf32>
    %c0_7 = arith.constant 0 : index
    %c0_8 = arith.constant 0 : index
    %6 = vector.load %arg4[%c0_7, %c0_8] : memref<32x1xf32, #tpu.memory_space<vmem>>, vector<32x1xf32>
    %7 = vector.broadcast %6 : vector<32x1xf32> to vector<32x256xf32>
    %8 = arith.addf %5, %7 : vector<32x256xf32>
    %9 = arith.addf %1, %8 : vector<32x256xf32>
    %cst_9 = arith.constant dense<0.000000e+00> : vector<32xf32>
    %10 = vector.multi_reduction <add>, %9, %cst_9 [1] : vector<32x256xf32> to vector<32xf32>
    %11 = vector.shape_cast %10 : vector<32xf32> to vector<32x1xf32>
    %cst_10 = arith.constant 2.560000e+02 : f32
    %12 = vector.broadcast %cst_10 : f32 to vector<32x1xf32>
    %13 = arith.divf %11, %12 : vector<32x1xf32>
    %c0_11 = arith.constant 0 : index
    %c0_12 = arith.constant 0 : index
    %14 = vector.load %arg5[%c0_11, %c0_12] : memref<2x32xf32, #tpu.memory_space<vmem>>, vector<2x32xf32>
    %cst_13 = arith.constant dense<0.000000e+00> : vector<2x1xf32>
    %15 = tpu.matmul %14, %13, %cst_13 {dimension_numbers = #tpu.dot_dimension_numbers<[1], [0], [0], [1], [0, 0, 1, 1], [], []>} : vector<2x32xf32>, vector<32x1xf32>, vector<2x1xf32> -> vector<2x1xf32>
    %c0_14 = arith.constant 0 : index
    %c0_15 = arith.constant 0 : index
    %16 = vector.load %arg6[%c0_14, %c0_15] : memref<2x1xf32, #tpu.memory_space<vmem>>, vector<2x1xf32>
    %17 = arith.addf %15, %16 : vector<2x1xf32>
    %cst_16 = arith.constant 0.000000e+00 : f32
    %18 = vector.broadcast %cst_16 : f32 to vector<2x1xf32>
    %19 = arith.maximumf %17, %18 : vector<2x1xf32>
    %c0_17 = arith.constant 0 : index
    %c0_18 = arith.constant 0 : index
    %20 = vector.load %arg7[%c0_17, %c0_18] : memref<32x2xf32, #tpu.memory_space<vmem>>, vector<32x2xf32>
    %cst_19 = arith.constant dense<0.000000e+00> : vector<32x1xf32>
    %21 = tpu.matmul %20, %19, %cst_19 {dimension_numbers = #tpu.dot_dimension_numbers<[1], [0], [0], [1], [0, 0, 1, 1], [], []>} : vector<32x2xf32>, vector<2x1xf32>, vector<32x1xf32> -> vector<32x1xf32>
    %c0_20 = arith.constant 0 : index
    %c0_21 = arith.constant 0 : index
    %22 = vector.load %arg8[%c0_20, %c0_21] : memref<32x1xf32, #tpu.memory_space<vmem>>, vector<32x1xf32>
    %23 = arith.addf %21, %22 : vector<32x1xf32>
    %cst_22 = arith.constant 0.000000e+00 : f32
    %24 = vector.broadcast %cst_22 : f32 to vector<32x1xf32>
    %25 = arith.subf %24, %23 : vector<32x1xf32>
    %26 = math.exp %25 : vector<32x1xf32>
    %cst_23 = arith.constant 1.000000e+00 : f32
    %27 = vector.broadcast %cst_23 : f32 to vector<32x1xf32>
    %28 = arith.addf %27, %26 : vector<32x1xf32>
    %29 = tpu.reciprocal %28 : vector<32x1xf32> -> vector<32x1xf32>
    %c0_24 = arith.constant 0 : index
    %c0_25 = arith.constant 0 : index
    %30 = vector.load %arg9[%c0_24, %c0_25] : memref<49x32xf32, #tpu.memory_space<vmem>>, vector<49x32xf32>
    %cst_26 = arith.constant dense<0.000000e+00> : vector<49x256xf32>
    %31 = tpu.matmul %30, %1, %cst_26 {dimension_numbers = #tpu.dot_dimension_numbers<[1], [0], [0], [1], [0, 0, 1, 1], [], []>} : vector<49x32xf32>, vector<32x256xf32>, vector<49x256xf32> -> vector<49x256xf32>
    %c0_27 = arith.constant 0 : index
    %c0_28 = arith.constant 0 : index
    %32 = vector.load %arg10[%c0_27, %c0_28] : memref<49x32xf32, #tpu.memory_space<vmem>>, vector<49x32xf32>
    %cst_29 = arith.constant dense<0.000000e+00> : vector<49x256xf32>
    %33 = tpu.matmul %32, %8, %cst_29 {dimension_numbers = #tpu.dot_dimension_numbers<[1], [0], [0], [1], [0, 0, 1, 1], [], []>} : vector<49x32xf32>, vector<32x256xf32>, vector<49x256xf32> -> vector<49x256xf32>
    %34 = arith.addf %31, %33 : vector<49x256xf32>
    %c0_30 = arith.constant 0 : index
    %c0_31 = arith.constant 0 : index
    %35 = vector.load %arg12[%c0_30, %c0_31] : memref<49x256xf32, #tpu.memory_space<vmem>>, vector<49x256xf32>
    %36 = arith.mulf %34, %35 : vector<49x256xf32>
    %c0_32 = arith.constant 0 : index
    %c0_33 = arith.constant 0 : index
    %37 = vector.load %arg14[%c0_32, %c0_33] : memref<49x256xf32, #tpu.memory_space<vmem>>, vector<49x256xf32>
    tpu.vector_store %arg14[%c0_32, %c0_33], %36 {strides = array<i32>} : memref<49x256xf32, #tpu.memory_space<vmem>>, vector<49x256xf32>,
    %c0_34 = arith.constant 0 : index
    %c0_35 = arith.constant 0 : index
    %38 = vector.load %arg14[%c0_34, %c0_35] : memref<49x256xf32, #tpu.memory_space<vmem>>, vector<1x256xf32>
    %c51_i32 = arith.constant 51 : i32
    %39 = tpu.dynamic_rotate %38 by %c51_i32 dim 1 : vector<1x256xf32>, i32 -> vector<1x256xf32>
    %c1 = arith.constant 1 : index
    %c0_36 = arith.constant 0 : index
    %40 = vector.load %arg14[%c1, %c0_36] : memref<49x256xf32, #tpu.memory_space<vmem>>, vector<1x256xf32>
    %c50_i32 = arith.constant 50 : i32
    %41 = tpu.dynamic_rotate %40 by %c50_i32 dim 1 : vector<1x256xf32>, i32 -> vector<1x256xf32>
    %42 = arith.addf %39, %41 : vector<1x256xf32>
    %c2 = arith.constant 2 : index
    %c0_37 = arith.constant 0 : index
    %43 = vector.load %arg14[%c2, %c0_37] : memref<49x256xf32, #tpu.memory_space<vmem>>, vector<1x256xf32>
    %c49_i32 = arith.constant 49 : i32
    %44 = tpu.dynamic_rotate %43 by %c49_i32 dim 1 : vector<1x256xf32>, i32 -> vector<1x256xf32>
    %45 = arith.addf %42, %44 : vector<1x256xf32>
    %c3 = arith.constant 3 : index
    %c0_38 = arith.constant 0 : index
    %46 = vector.load %arg14[%c3, %c0_38] : memref<49x256xf32, #tpu.memory_space<vmem>>, vector<1x256xf32>
    %c48_i32 = arith.constant 48 : i32
    %47 = tpu.dynamic_rotate %46 by %c48_i32 dim 1 : vector<1x256xf32>, i32 -> vector<1x256xf32>
    %48 = arith.addf %45, %47 : vector<1x256xf32>
    %c4 = arith.constant 4 : index
    %c0_39 = arith.constant 0 : index
    %49 = vector.load %arg14[%c4, %c0_39] : memref<49x256xf32, #tpu.memory_space<vmem>>, vector<1x256xf32>
    %c47_i32 = arith.constant 47 : i32
    %50 = tpu.dynamic_rotate %49 by %c47_i32 dim 1 : vector<1x256xf32>, i32 -> vector<1x256xf32>
    %51 = arith.addf %48, %50 : vector<1x256xf32>
    %c5 = arith.constant 5 : index
    %c0_40 = arith.constant 0 : index
    %52 = vector.load %arg14[%c5, %c0_40] : memref<49x256xf32, #tpu.memory_space<vmem>>, vector<1x256xf32>
    %c46_i32 = arith.constant 46 : i32
    %53 = tpu.dynamic_rotate %52 by %c46_i32 dim 1 : vector<1x256xf32>, i32 -> vector<1x256xf32>
    %54 = arith.addf %51, %53 : vector<1x256xf32>
    %c6 = arith.constant 6 : index
    %c0_41 = arith.constant 0 : index
    %55 = vector.load %arg14[%c6, %c0_41] : memref<49x256xf32, #tpu.memory_space<vmem>>, vector<1x256xf32>
    %c45_i32 = arith.constant 45 : i32
    %56 = tpu.dynamic_rotate %55 by %c45_i32 dim 1 : vector<1x256xf32>, i32 -> vector<1x256xf32>
    %57 = arith.addf %54, %56 : vector<1x256xf32>
    %c7 = arith.constant 7 : index
    %c0_42 = arith.constant 0 : index
    %58 = vector.load %arg14[%c7, %c0_42] : memref<49x256xf32, #tpu.memory_space<vmem>>, vector<1x256xf32>
    %c35_i32 = arith.constant 35 : i32
    %59 = tpu.dynamic_rotate %58 by %c35_i32 dim 1 : vector<1x256xf32>, i32 -> vector<1x256xf32>
    %c8 = arith.constant 8 : index
    %c0_43 = arith.constant 0 : index
    %60 = vector.load %arg14[%c8, %c0_43] : memref<49x256xf32, #tpu.memory_space<vmem>>, vector<1x256xf32>
    %c34_i32 = arith.constant 34 : i32
    %61 = tpu.dynamic_rotate %60 by %c34_i32 dim 1 : vector<1x256xf32>, i32 -> vector<1x256xf32>
    %62 = arith.addf %59, %61 : vector<1x256xf32>
    %c9 = arith.constant 9 : index
    %c0_44 = arith.constant 0 : index
    %63 = vector.load %arg14[%c9, %c0_44] : memref<49x256xf32, #tpu.memory_space<vmem>>, vector<1x256xf32>
    %c33_i32 = arith.constant 33 : i32
    %64 = tpu.dynamic_rotate %63 by %c33_i32 dim 1 : vector<1x256xf32>, i32 -> vector<1x256xf32>
    %65 = arith.addf %62, %64 : vector<1x256xf32>
    %c10 = arith.constant 10 : index
    %c0_45 = arith.constant 0 : index
    %66 = vector.load %arg14[%c10, %c0_45] : memref<49x256xf32, #tpu.memory_space<vmem>>, vector<1x256xf32>
    %c32_i32 = arith.constant 32 : i32
    %67 = tpu.dynamic_rotate %66 by %c32_i32 dim 1 : vector<1x256xf32>, i32 -> vector<1x256xf32>
    %68 = arith.addf %65, %67 : vector<1x256xf32>
    %c11 = arith.constant 11 : index
    %c0_46 = arith.constant 0 : index
    %69 = vector.load %arg14[%c11, %c0_46] : memref<49x256xf32, #tpu.memory_space<vmem>>, vector<1x256xf32>
    %c31_i32 = arith.constant 31 : i32
    %70 = tpu.dynamic_rotate %69 by %c31_i32 dim 1 : vector<1x256xf32>, i32 -> vector<1x256xf32>
    %71 = arith.addf %68, %70 : vector<1x256xf32>
    %c12 = arith.constant 12 : index
    %c0_47 = arith.constant 0 : index
    %72 = vector.load %arg14[%c12, %c0_47] : memref<49x256xf32, #tpu.memory_space<vmem>>, vector<1x256xf32>
    %c30_i32 = arith.constant 30 : i32
    %73 = tpu.dynamic_rotate %72 by %c30_i32 dim 1 : vector<1x256xf32>, i32 -> vector<1x256xf32>
    %74 = arith.addf %71, %73 : vector<1x256xf32>
    %c13 = arith.constant 13 : index
    %c0_48 = arith.constant 0 : index
    %75 = vector.load %arg14[%c13, %c0_48] : memref<49x256xf32, #tpu.memory_space<vmem>>, vector<1x256xf32>
    %c29_i32 = arith.constant 29 : i32
    %76 = tpu.dynamic_rotate %75 by %c29_i32 dim 1 : vector<1x256xf32>, i32 -> vector<1x256xf32>
    %77 = arith.addf %74, %76 : vector<1x256xf32>
    %c14 = arith.constant 14 : index
    %c0_49 = arith.constant 0 : index
    %78 = vector.load %arg14[%c14, %c0_49] : memref<49x256xf32, #tpu.memory_space<vmem>>, vector<1x256xf32>
    %c19_i32 = arith.constant 19 : i32
    %79 = tpu.dynamic_rotate %78 by %c19_i32 dim 1 : vector<1x256xf32>, i32 -> vector<1x256xf32>
    %c15 = arith.constant 15 : index
    %c0_50 = arith.constant 0 : index
    %80 = vector.load %arg14[%c15, %c0_50] : memref<49x256xf32, #tpu.memory_space<vmem>>, vector<1x256xf32>
    %c18_i32 = arith.constant 18 : i32
    %81 = tpu.dynamic_rotate %80 by %c18_i32 dim 1 : vector<1x256xf32>, i32 -> vector<1x256xf32>
    %82 = arith.addf %79, %81 : vector<1x256xf32>
    %c16 = arith.constant 16 : index
    %c0_51 = arith.constant 0 : index
    %83 = vector.load %arg14[%c16, %c0_51] : memref<49x256xf32, #tpu.memory_space<vmem>>, vector<1x256xf32>
    %c17_i32 = arith.constant 17 : i32
    %84 = tpu.dynamic_rotate %83 by %c17_i32 dim 1 : vector<1x256xf32>, i32 -> vector<1x256xf32>
    %85 = arith.addf %82, %84 : vector<1x256xf32>
    %c17 = arith.constant 17 : index
    %c0_52 = arith.constant 0 : index
    %86 = vector.load %arg14[%c17, %c0_52] : memref<49x256xf32, #tpu.memory_space<vmem>>, vector<1x256xf32>
    %c16_i32 = arith.constant 16 : i32
    %87 = tpu.dynamic_rotate %86 by %c16_i32 dim 1 : vector<1x256xf32>, i32 -> vector<1x256xf32>
    %88 = arith.addf %85, %87 : vector<1x256xf32>
    %c18 = arith.constant 18 : index
    %c0_53 = arith.constant 0 : index
    %89 = vector.load %arg14[%c18, %c0_53] : memref<49x256xf32, #tpu.memory_space<vmem>>, vector<1x256xf32>
    %c15_i32 = arith.constant 15 : i32
    %90 = tpu.dynamic_rotate %89 by %c15_i32 dim 1 : vector<1x256xf32>, i32 -> vector<1x256xf32>
    %91 = arith.addf %88, %90 : vector<1x256xf32>
    %c19 = arith.constant 19 : index
    %c0_54 = arith.constant 0 : index
    %92 = vector.load %arg14[%c19, %c0_54] : memref<49x256xf32, #tpu.memory_space<vmem>>, vector<1x256xf32>
    %c14_i32 = arith.constant 14 : i32
    %93 = tpu.dynamic_rotate %92 by %c14_i32 dim 1 : vector<1x256xf32>, i32 -> vector<1x256xf32>
    %94 = arith.addf %91, %93 : vector<1x256xf32>
    %c20 = arith.constant 20 : index
    %c0_55 = arith.constant 0 : index
    %95 = vector.load %arg14[%c20, %c0_55] : memref<49x256xf32, #tpu.memory_space<vmem>>, vector<1x256xf32>
    %c13_i32 = arith.constant 13 : i32
    %96 = tpu.dynamic_rotate %95 by %c13_i32 dim 1 : vector<1x256xf32>, i32 -> vector<1x256xf32>
    %97 = arith.addf %94, %96 : vector<1x256xf32>
    %c21 = arith.constant 21 : index
    %c0_56 = arith.constant 0 : index
    %98 = vector.load %arg14[%c21, %c0_56] : memref<49x256xf32, #tpu.memory_space<vmem>>, vector<1x256xf32>
    %c3_i32 = arith.constant 3 : i32
    %99 = tpu.dynamic_rotate %98 by %c3_i32 dim 1 : vector<1x256xf32>, i32 -> vector<1x256xf32>
    %c22 = arith.constant 22 : index
    %c0_57 = arith.constant 0 : index
    %100 = vector.load %arg14[%c22, %c0_57] : memref<49x256xf32, #tpu.memory_space<vmem>>, vector<1x256xf32>
    %c2_i32 = arith.constant 2 : i32
    %101 = tpu.dynamic_rotate %100 by %c2_i32 dim 1 : vector<1x256xf32>, i32 -> vector<1x256xf32>
    %102 = arith.addf %99, %101 : vector<1x256xf32>
    %c23 = arith.constant 23 : index
    %c0_58 = arith.constant 0 : index
    %103 = vector.load %arg14[%c23, %c0_58] : memref<49x256xf32, #tpu.memory_space<vmem>>, vector<1x256xf32>
    %c1_i32 = arith.constant 1 : i32
    %104 = tpu.dynamic_rotate %103 by %c1_i32 dim 1 : vector<1x256xf32>, i32 -> vector<1x256xf32>
    %105 = arith.addf %102, %104 : vector<1x256xf32>
    %c24 = arith.constant 24 : index
    %c0_59 = arith.constant 0 : index
    %106 = vector.load %arg14[%c24, %c0_59] : memref<49x256xf32, #tpu.memory_space<vmem>>, vector<1x256xf32>
    %c0_i32 = arith.constant 0 : i32
    %107 = tpu.dynamic_rotate %106 by %c0_i32 dim 1 : vector<1x256xf32>, i32 -> vector<1x256xf32>
    %108 = arith.addf %105, %107 : vector<1x256xf32>
    %c25 = arith.constant 25 : index
    %c0_60 = arith.constant 0 : index
    %109 = vector.load %arg14[%c25, %c0_60] : memref<49x256xf32, #tpu.memory_space<vmem>>, vector<1x256xf32>
    %c255_i32 = arith.constant 255 : i32
    %110 = tpu.dynamic_rotate %109 by %c255_i32 dim 1 : vector<1x256xf32>, i32 -> vector<1x256xf32>
    %111 = arith.addf %108, %110 : vector<1x256xf32>
    %c26 = arith.constant 26 : index
    %c0_61 = arith.constant 0 : index
    %112 = vector.load %arg14[%c26, %c0_61] : memref<49x256xf32, #tpu.memory_space<vmem>>, vector<1x256xf32>
    %c254_i32 = arith.constant 254 : i32
    %113 = tpu.dynamic_rotate %112 by %c254_i32 dim 1 : vector<1x256xf32>, i32 -> vector<1x256xf32>
    %114 = arith.addf %111, %113 : vector<1x256xf32>
    %c27 = arith.constant 27 : index
    %c0_62 = arith.constant 0 : index
    %115 = vector.load %arg14[%c27, %c0_62] : memref<49x256xf32, #tpu.memory_space<vmem>>, vector<1x256xf32>
    %c253_i32 = arith.constant 253 : i32
    %116 = tpu.dynamic_rotate %115 by %c253_i32 dim 1 : vector<1x256xf32>, i32 -> vector<1x256xf32>
    %117 = arith.addf %114, %116 : vector<1x256xf32>
    %c28 = arith.constant 28 : index
    %c0_63 = arith.constant 0 : index
    %118 = vector.load %arg14[%c28, %c0_63] : memref<49x256xf32, #tpu.memory_space<vmem>>, vector<1x256xf32>
    %c243_i32 = arith.constant 243 : i32
    %119 = tpu.dynamic_rotate %118 by %c243_i32 dim 1 : vector<1x256xf32>, i32 -> vector<1x256xf32>
    %c29 = arith.constant 29 : index
    %c0_64 = arith.constant 0 : index
    %120 = vector.load %arg14[%c29, %c0_64] : memref<49x256xf32, #tpu.memory_space<vmem>>, vector<1x256xf32>
    %c242_i32 = arith.constant 242 : i32
    %121 = tpu.dynamic_rotate %120 by %c242_i32 dim 1 : vector<1x256xf32>, i32 -> vector<1x256xf32>
    %122 = arith.addf %119, %121 : vector<1x256xf32>
    %c30 = arith.constant 30 : index
    %c0_65 = arith.constant 0 : index
    %123 = vector.load %arg14[%c30, %c0_65] : memref<49x256xf32, #tpu.memory_space<vmem>>, vector<1x256xf32>
    %c241_i32 = arith.constant 241 : i32
    %124 = tpu.dynamic_rotate %123 by %c241_i32 dim 1 : vector<1x256xf32>, i32 -> vector<1x256xf32>
    %125 = arith.addf %122, %124 : vector<1x256xf32>
    %c31 = arith.constant 31 : index
    %c0_66 = arith.constant 0 : index
    %126 = vector.load %arg14[%c31, %c0_66] : memref<49x256xf32, #tpu.memory_space<vmem>>, vector<1x256xf32>
    %c240_i32 = arith.constant 240 : i32
    %127 = tpu.dynamic_rotate %126 by %c240_i32 dim 1 : vector<1x256xf32>, i32 -> vector<1x256xf32>
    %128 = arith.addf %125, %127 : vector<1x256xf32>
    %c32 = arith.constant 32 : index
    %c0_67 = arith.constant 0 : index
    %129 = vector.load %arg14[%c32, %c0_67] : memref<49x256xf32, #tpu.memory_space<vmem>>, vector<1x256xf32>
    %c239_i32 = arith.constant 239 : i32
    %130 = tpu.dynamic_rotate %129 by %c239_i32 dim 1 : vector<1x256xf32>, i32 -> vector<1x256xf32>
    %131 = arith.addf %128, %130 : vector<1x256xf32>
    %c33 = arith.constant 33 : index
    %c0_68 = arith.constant 0 : index
    %132 = vector.load %arg14[%c33, %c0_68] : memref<49x256xf32, #tpu.memory_space<vmem>>, vector<1x256xf32>
    %c238_i32 = arith.constant 238 : i32
    %133 = tpu.dynamic_rotate %132 by %c238_i32 dim 1 : vector<1x256xf32>, i32 -> vector<1x256xf32>
    %134 = arith.addf %131, %133 : vector<1x256xf32>
    %c34 = arith.constant 34 : index
    %c0_69 = arith.constant 0 : index
    %135 = vector.load %arg14[%c34, %c0_69] : memref<49x256xf32, #tpu.memory_space<vmem>>, vector<1x256xf32>
    %c237_i32 = arith.constant 237 : i32
    %136 = tpu.dynamic_rotate %135 by %c237_i32 dim 1 : vector<1x256xf32>, i32 -> vector<1x256xf32>
    %137 = arith.addf %134, %136 : vector<1x256xf32>
    %c35 = arith.constant 35 : index
    %c0_70 = arith.constant 0 : index
    %138 = vector.load %arg14[%c35, %c0_70] : memref<49x256xf32, #tpu.memory_space<vmem>>, vector<1x256xf32>
    %c227_i32 = arith.constant 227 : i32
    %139 = tpu.dynamic_rotate %138 by %c227_i32 dim 1 : vector<1x256xf32>, i32 -> vector<1x256xf32>
    %c36 = arith.constant 36 : index
    %c0_71 = arith.constant 0 : index
    %140 = vector.load %arg14[%c36, %c0_71] : memref<49x256xf32, #tpu.memory_space<vmem>>, vector<1x256xf32>
    %c226_i32 = arith.constant 226 : i32
    %141 = tpu.dynamic_rotate %140 by %c226_i32 dim 1 : vector<1x256xf32>, i32 -> vector<1x256xf32>
    %142 = arith.addf %139, %141 : vector<1x256xf32>
    %c37 = arith.constant 37 : index
    %c0_72 = arith.constant 0 : index
    %143 = vector.load %arg14[%c37, %c0_72] : memref<49x256xf32, #tpu.memory_space<vmem>>, vector<1x256xf32>
    %c225_i32 = arith.constant 225 : i32
    %144 = tpu.dynamic_rotate %143 by %c225_i32 dim 1 : vector<1x256xf32>, i32 -> vector<1x256xf32>
    %145 = arith.addf %142, %144 : vector<1x256xf32>
    %c38 = arith.constant 38 : index
    %c0_73 = arith.constant 0 : index
    %146 = vector.load %arg14[%c38, %c0_73] : memref<49x256xf32, #tpu.memory_space<vmem>>, vector<1x256xf32>
    %c224_i32 = arith.constant 224 : i32
    %147 = tpu.dynamic_rotate %146 by %c224_i32 dim 1 : vector<1x256xf32>, i32 -> vector<1x256xf32>
    %148 = arith.addf %145, %147 : vector<1x256xf32>
    %c39 = arith.constant 39 : index
    %c0_74 = arith.constant 0 : index
    %149 = vector.load %arg14[%c39, %c0_74] : memref<49x256xf32, #tpu.memory_space<vmem>>, vector<1x256xf32>
    %c223_i32 = arith.constant 223 : i32
    %150 = tpu.dynamic_rotate %149 by %c223_i32 dim 1 : vector<1x256xf32>, i32 -> vector<1x256xf32>
    %151 = arith.addf %148, %150 : vector<1x256xf32>
    %c40 = arith.constant 40 : index
    %c0_75 = arith.constant 0 : index
    %152 = vector.load %arg14[%c40, %c0_75] : memref<49x256xf32, #tpu.memory_space<vmem>>, vector<1x256xf32>
    %c222_i32 = arith.constant 222 : i32
    %153 = tpu.dynamic_rotate %152 by %c222_i32 dim 1 : vector<1x256xf32>, i32 -> vector<1x256xf32>
    %154 = arith.addf %151, %153 : vector<1x256xf32>
    %c41 = arith.constant 41 : index
    %c0_76 = arith.constant 0 : index
    %155 = vector.load %arg14[%c41, %c0_76] : memref<49x256xf32, #tpu.memory_space<vmem>>, vector<1x256xf32>
    %c221_i32 = arith.constant 221 : i32
    %156 = tpu.dynamic_rotate %155 by %c221_i32 dim 1 : vector<1x256xf32>, i32 -> vector<1x256xf32>
    %157 = arith.addf %154, %156 : vector<1x256xf32>
    %c42 = arith.constant 42 : index
    %c0_77 = arith.constant 0 : index
    %158 = vector.load %arg14[%c42, %c0_77] : memref<49x256xf32, #tpu.memory_space<vmem>>, vector<1x256xf32>
    %c211_i32 = arith.constant 211 : i32
    %159 = tpu.dynamic_rotate %158 by %c211_i32 dim 1 : vector<1x256xf32>, i32 -> vector<1x256xf32>
    %c43 = arith.constant 43 : index
    %c0_78 = arith.constant 0 : index
    %160 = vector.load %arg14[%c43, %c0_78] : memref<49x256xf32, #tpu.memory_space<vmem>>, vector<1x256xf32>
    %c210_i32 = arith.constant 210 : i32
    %161 = tpu.dynamic_rotate %160 by %c210_i32 dim 1 : vector<1x256xf32>, i32 -> vector<1x256xf32>
    %162 = arith.addf %159, %161 : vector<1x256xf32>
    %c44 = arith.constant 44 : index
    %c0_79 = arith.constant 0 : index
    %163 = vector.load %arg14[%c44, %c0_79] : memref<49x256xf32, #tpu.memory_space<vmem>>, vector<1x256xf32>
    %c209_i32 = arith.constant 209 : i32
    %164 = tpu.dynamic_rotate %163 by %c209_i32 dim 1 : vector<1x256xf32>, i32 -> vector<1x256xf32>
    %165 = arith.addf %162, %164 : vector<1x256xf32>
    %c45 = arith.constant 45 : index
    %c0_80 = arith.constant 0 : index
    %166 = vector.load %arg14[%c45, %c0_80] : memref<49x256xf32, #tpu.memory_space<vmem>>, vector<1x256xf32>
    %c208_i32 = arith.constant 208 : i32
    %167 = tpu.dynamic_rotate %166 by %c208_i32 dim 1 : vector<1x256xf32>, i32 -> vector<1x256xf32>
    %168 = arith.addf %165, %167 : vector<1x256xf32>
    %c46 = arith.constant 46 : index
    %c0_81 = arith.constant 0 : index
    %169 = vector.load %arg14[%c46, %c0_81] : memref<49x256xf32, #tpu.memory_space<vmem>>, vector<1x256xf32>
    %c207_i32 = arith.constant 207 : i32
    %170 = tpu.dynamic_rotate %169 by %c207_i32 dim 1 : vector<1x256xf32>, i32 -> vector<1x256xf32>
    %171 = arith.addf %168, %170 : vector<1x256xf32>
    %c47 = arith.constant 47 : index
    %c0_82 = arith.constant 0 : index
    %172 = vector.load %arg14[%c47, %c0_82] : memref<49x256xf32, #tpu.memory_space<vmem>>, vector<1x256xf32>
    %c206_i32 = arith.constant 206 : i32
    %173 = tpu.dynamic_rotate %172 by %c206_i32 dim 1 : vector<1x256xf32>, i32 -> vector<1x256xf32>
    %174 = arith.addf %171, %173 : vector<1x256xf32>
    %c48 = arith.constant 48 : index
    %c0_83 = arith.constant 0 : index
    %175 = vector.load %arg14[%c48, %c0_83] : memref<49x256xf32, #tpu.memory_space<vmem>>, vector<1x256xf32>
    %c205_i32 = arith.constant 205 : i32
    %176 = tpu.dynamic_rotate %175 by %c205_i32 dim 1 : vector<1x256xf32>, i32 -> vector<1x256xf32>
    %177 = arith.addf %174, %176 : vector<1x256xf32>
    %178 = arith.addf %57, %77 : vector<1x256xf32>
    %179 = arith.addf %97, %117 : vector<1x256xf32>
    %180 = arith.addf %178, %179 : vector<1x256xf32>
    %181 = arith.addf %137, %157 : vector<1x256xf32>
    %182 = arith.addf %181, %177 : vector<1x256xf32>
    %183 = arith.addf %180, %182 : vector<1x256xf32>
    %c0_84 = arith.constant 0 : index
    %c0_85 = arith.constant 0 : index
    %184 = vector.load %arg11[%c0_84, %c0_85] : memref<1x1xf32, #tpu.memory_space<vmem>>, vector<1x1xf32>
    %185 = vector.broadcast %184 : vector<1x1xf32> to vector<1x256xf32>
    %186 = arith.addf %183, %185 : vector<1x256xf32>
    %cst_86 = arith.constant 0.000000e+00 : f32
    %187 = vector.broadcast %cst_86 : f32 to vector<1x256xf32>
    %188 = arith.subf %187, %186 : vector<1x256xf32>
    %189 = math.exp %188 : vector<1x256xf32>
    %cst_87 = arith.constant 1.000000e+00 : f32
    %190 = vector.broadcast %cst_87 : f32 to vector<1x256xf32>
    %191 = arith.addf %190, %189 : vector<1x256xf32>
    %192 = tpu.reciprocal %191 : vector<1x256xf32> -> vector<1x256xf32>
    %193 = vector.broadcast %29 : vector<32x1xf32> to vector<32x256xf32>
    %194 = arith.mulf %1, %193 : vector<32x256xf32>
    %195 = vector.broadcast %192 : vector<1x256xf32> to vector<32x256xf32>
    %196 = arith.mulf %8, %195 : vector<32x256xf32>
    %197 = arith.addf %194, %196 : vector<32x256xf32>
    %c0_88 = arith.constant 0 : index
    %c0_89 = arith.constant 0 : index
    %c0_90 = arith.constant 0 : index
    %198 = vector.load %arg13[%c0_88, %c0_89, %c0_90] : memref<1x32x256xf32, #tpu.memory_space<vmem>>, vector<1x32x256xf32>
    %199 = vector.shape_cast %198 : vector<1x32x256xf32> to vector<32x256xf32>
    %200 = vector.shape_cast %197 : vector<32x256xf32> to vector<1x32x256xf32>
    tpu.vector_store %arg13[%c0_88, %c0_89, %c0_90], %200 {strides = array<i32>} : memref<1x32x256xf32, #tpu.memory_space<vmem>>, vector<1x32x256xf32>,
    return
  }
  func.func @transform_0(%arg0: i32) -> (i32, i32, i32) {
    %c0_i32 = arith.constant 0 : i32
    %c0_i32_0 = arith.constant 0 : i32
    %c0_i32_1 = arith.constant 0 : i32
    return %arg0, %c0_i32, %c0_i32_0 : i32, i32, i32
  }
  func.func @transform_1(%arg0: i32) -> (i32, i32, i32) {
    %c0_i32 = arith.constant 0 : i32
    %c0_i32_0 = arith.constant 0 : i32
    %c0_i32_1 = arith.constant 0 : i32
    return %arg0, %c0_i32, %c0_i32_0 : i32, i32, i32
  }
  func.func @transform_2(%arg0: i32) -> (i32, i32) {
    %c0_i32 = arith.constant 0 : i32
    %c0_i32_0 = arith.constant 0 : i32
    %c0_i32_1 = arith.constant 0 : i32
    return %c0_i32, %c0_i32_0 : i32, i32
  }
  func.func @transform_3(%arg0: i32) -> (i32, i32) {
    %c0_i32 = arith.constant 0 : i32
    %c0_i32_0 = arith.constant 0 : i32
    %c0_i32_1 = arith.constant 0 : i32
    return %c0_i32, %c0_i32_0 : i32, i32
  }
  func.func @transform_4(%arg0: i32) -> (i32, i32) {
    %c0_i32 = arith.constant 0 : i32
    %c0_i32_0 = arith.constant 0 : i32
    %c0_i32_1 = arith.constant 0 : i32
    return %c0_i32, %c0_i32_0 : i32, i32
  }
  func.func @transform_5(%arg0: i32) -> (i32, i32) {
    %c0_i32 = arith.constant 0 : i32
    %c0_i32_0 = arith.constant 0 : i32
    %c0_i32_1 = arith.constant 0 : i32
    return %c0_i32, %c0_i32_0 : i32, i32
  }
  func.func @transform_6(%arg0: i32) -> (i32, i32) {
    %c0_i32 = arith.constant 0 : i32
    %c0_i32_0 = arith.constant 0 : i32
    %c0_i32_1 = arith.constant 0 : i32
    return %c0_i32, %c0_i32_0 : i32, i32
  }
  func.func @transform_7(%arg0: i32) -> (i32, i32) {
    %c0_i32 = arith.constant 0 : i32
    %c0_i32_0 = arith.constant 0 : i32
    %c0_i32_1 = arith.constant 0 : i32
    return %c0_i32, %c0_i32_0 : i32, i32
  }
  func.func @transform_8(%arg0: i32) -> (i32, i32) {
    %c0_i32 = arith.constant 0 : i32
    %c0_i32_0 = arith.constant 0 : i32
    %c0_i32_1 = arith.constant 0 : i32
    return %c0_i32, %c0_i32_0 : i32, i32
  }
  func.func @transform_9(%arg0: i32) -> (i32, i32) {
    %c0_i32 = arith.constant 0 : i32
    %c0_i32_0 = arith.constant 0 : i32
    %c0_i32_1 = arith.constant 0 : i32
    return %c0_i32, %c0_i32_0 : i32, i32
  }
  func.func @transform_10(%arg0: i32) -> (i32, i32) {
    %c0_i32 = arith.constant 0 : i32
    %c0_i32_0 = arith.constant 0 : i32
    %c0_i32_1 = arith.constant 0 : i32
    return %c0_i32, %c0_i32_0 : i32, i32
  }
  func.func @transform_11(%arg0: i32) -> (i32, i32) {
    %c0_i32 = arith.constant 0 : i32
    %c0_i32_0 = arith.constant 0 : i32
    %c0_i32_1 = arith.constant 0 : i32
    return %c0_i32, %c0_i32_0 : i32, i32
  }
  func.func @transform_12(%arg0: i32) -> (i32, i32, i32) {
    %c0_i32 = arith.constant 0 : i32
    %c0_i32_0 = arith.constant 0 : i32
    %c0_i32_1 = arith.constant 0 : i32
    return %arg0, %c0_i32, %c0_i32_0 : i32, i32, i32
  }
}

</mosaic_0001>

<bundles_post_ra>
// kernel: tpu_custom_call.1
= control target key start
LH: loop header
LB: loop body
LE: loop exit
PB: predicated region body
PF: predicated region fallthrough
CT: control target
= control target key end

     0   :  { %s3548_s0 = inlined_call_operand.vmem [shape: f32[2,32,256], index: 0, kind: input, shape index: {}]   ;;  %s3549_s1 = inlined_call_operand.vmem [shape: f32[2,32,256], index: 1, kind: input, shape index: {}]   ;;  %s3550_s2 = inlined_call_operand.vmem [shape: f32[32,32], index: 2, kind: input, shape index: {}]   ;;  %s3551_s3 = inlined_call_operand.vmem [shape: f32[32,1], index: 3, kind: input, shape index: {}]   ;;  %s3552_s4 = inlined_call_operand.vmem [shape: f32[2,32], index: 4, kind: input, shape index: {}]   ;;  %s3553_s5 = inlined_call_operand.vmem [shape: f32[2,1], index: 5, kind: input, shape index: {}]   ;;  %s3554_s6 = inlined_call_operand.vmem [shape: f32[32,2], index: 6, kind: input, shape index: {}]   ;;  %s3555_s7 = inlined_call_operand.vmem [shape: f32[32,1], index: 7, kind: input, shape index: {}]   ;;  %s3556_s8 = inlined_call_operand.vmem [shape: f32[49,32], index: 8, kind: input, shape index: {}]   ;;  %s3557_s9 = inlined_call_operand.vmem [shape: f32[49,32], index: 9, kind: input, shape index: {}]   ;;  %s3558_s10 = inlined_call_operand.<no memory space> [shape: f32[1,1], index: 10, kind: input, shape index: {}]   ;;  %s3559_s11 = inlined_call_operand.hbm [shape: f32[49,256], index: 11, kind: input, shape index: {}]   ;;  %s3560_s12 = inlined_call_operand.hbm [shape: f32[2,32,256], index: 12, kind: output, shape index: {}]  }
   0x1   :  { %v17_v0 = vstv %s3558_s10 }
   0x2   :  { %18 = vst [vmem:[#allocation3] sm:$0x1] %v17_v0 }
   0x3   :  { %19 = vsyncpa [#allocation5], 0 }
   0x4   :  { %20 = vsyncpa [#allocation6], 0 }
   0x5   :  { %22 = vsyncpa [#allocation6 + $0x1], 0  ;;  %s2866_s23 = smov 0   ;;  %s2868_s24 = smov 0  }
   0x6   :  { %s2870_s25 = smov 0   ;;  %s2872_s26 = smov 0  }
   0x7 LB: > { %s2887_s10 = sadd.s32 4294967295, %s2739_s26   ;;  %s2390_s27 = sadd.s32 4294967294, %s2739_s26   ;;  %s2739_s26 = sphi %s2872_s26, %s3580_s26   ;;  %s2735_s25 = sphi %s2870_s25, %s3579_s25   ;;  %s2731_s24 = sphi %s2868_s24, %s3578_s24   ;;  %s2727_s23 = sphi %s2866_s23, %s3577_s23  }
   0x8   : > { %s2891_s28 = sadd.s32 1, %s2739_s26   ;;  %s297_s29 = sadd.s32 1, %s2735_s25 }
   0x9   : > { %s294_s30 = ssub.s32 %s2739_s26, %s2891_s28  ;;  %p307_p0 = scmp.ne.s32.totalorder %s2735_s25, %s2731_s24 }
   0xa   : > { %p295_p1 = scmp.eq.s32.totalorder %s294_s30, 0  ;;  %p308_p2 = scmp.eq.s32.totalorder %s2887_s10, 1 }
   0xb   : > { %p313_p3 = scmp.ne.s32.totalorder %s2731_s24, %s2727_s23  ;;  %p314_p4 = scmp.eq.s32.totalorder %s2390_s27, 1 }
   0xc   : > { %s2902_s13 = scalar_select %p295_p1, %s2735_s25, %s297_s29  }
   0xd   : > { %p2904_p5 = por %p308_p2, %p307_p0  ;;  %p2908_p6 = por %p314_p4, %p313_p3 }
   0xe   : > { %3565 = sst [smem:[#allocation10_spill]] %s2902_s13  ;;  %p2391_p7 = scmp.ge.s32.totalorder %s2739_s26, 1 }
   0xf   : > { %s3566_s14 = scalar_select %p2904_p5, 1, 0 }
  0x10   : > { %s3567_s15 = scalar_select %p2908_p6, 1, 0 }
  0x11   : > { %p321_p8 = scmp.lt.s32.totalorder %s2739_s26, 3  ;;  %p3561_p9 = scmp.eq.s32.totalorder %s2887_s10, 0 }
  0x12   : > { %s2741_s17 = smov [#allocation4]   ;;  %s2645_s22 = scalar_lea.hbm %s3559_s11, 1792 }
  0x13   : > { %p2915_p10 = pnand %p2391_p7, %p321_p8  ;;  %s360_s18 = sshll.u32 %s2741_s17, 4  ;;  %s361_s18 = int_to_ptr.vmem [resolvable:$true] %s360_s18 }
  0x14   : > { %p2646_p13 = scmp.ne.s32.totalorder %s3559_s11, %s2645_s22  ;;  %p2652_p3 = scmp.lt.u32.totalorder %s2645_s22, %s3559_s11 }
  0x15   : > { %s3568_s16 = scalar_select %p2915_p10, 1, 0 }
  0x16   : > { %p2512_p11 = pneg %p2915_p10 }
  0x18   : > { %p2923_p12 = pnand %p3561_p9, %p2512_p11 }
  0x1a   : > { %p2647_p0 = pneg %p2923_p12 }
  0x1c   : > { %p2648_p1 = pnand %p2647_p0, %p2646_p13 }
  0x1e   : > { %p2649_p2 = pneg %p2648_p1 }
  0x20   : > { %p2654_p4 = pnand %p2652_p3, %p2649_p2 }
  0x22   : > { %2657 = shalt.err (!%p2654_p4)
}
  0x23   : > { %s2658_s13 = scalar_lea.vmem %s361_s18, 1792  ;;  %p2666_p9 = scmp.lt.s32.totalorder %s361_s18, %s361_s18 }
  0x24   : > { %p2659_p7 = scmp.ne.s32.totalorder %s361_s18, %s2658_s13  ;;  %p2667_p6 = scmp.lt.s32.totalorder %s2658_s13, %s2658_s13 }
  0x26   : > { %p2661_p8 = pnand %p2659_p7, %p2647_p0  ;;  %p2668_p5 = por %p2667_p6, %p2666_p9 }
  0x28   : > { %p2662_p11 = pneg %p2661_p8 }
  0x2a   : > { %p2669_p10 = pnand %p2668_p5, %p2662_p11 }
  0x2c   : > { %2672 = shalt.err (!%p2669_p10)
}
  0x2d   : > { %s2742_s20 = smov 256   ;;  %s2743_s21 = smov 16  }
  0x2e   : > { %2515 = dma.hbm_to_vmem [thread:$0]  (!%p2923_p12), %s3559_s11, 1792, %s361_s18, [#allocation5], %s2742_s20, %s2742_s20, %s2743_s21  }
  0x2f   : > { %p3570_p13 = scmp.ne.s32.totalorder %s3568_s16, 0 }
  0x30   : > { %p3571_p1 = scmp.eq.s32.totalorder (!%p3570_p13), %s2887_s10, 0 }
  0x31   : > { %392 = sbr.rel (%p3570_p13) target bundleno = 1275 (0x4fb), region = 68 }
  0x38   : > { %2718 = dma.done.wait (%p3571_p1), [#allocation5], 1792   ;;  %p3572_p0 = pmov %p3571_p1 }
  0x39   : > { %p439_p5 = scmp.lt.s32.totalorder %s2887_s10, 1  ;;  %v2744_v1 = vmov 0.0   ;;  %v2745_v2 = vmov 0   ;;  %v469_v15 = vld [vmem:[%s3551_s3] sm:$0xff]  ;;  %v471_v16 = vld [vmem:[%s3551_s3 + $0x10] sm:$0xff]  ;;  %v470_v17 = vld [vmem:[%s3551_s3 + $0x8] sm:$0xff] }
  0x3a   : > { %2720 = vsyncadd (%p3572_p0), [#allocation5], 4294965504  ;;  %570 = vmatprep.mubr.f32.mxu0 %v2744_v1  ;;  %2611 = vset.pattern.permute.xlu0 %v2745_v2  ;;  %v472_v18 = vld [vmem:[%s3551_s3 + $0x18] sm:$0xff]  ;;  %v465_v19 = vld [vmem:[%s3550_s2] sm:$0xff]  ;;  %vm493_vm0 = vcmask 261120   ;;  %vm2747_vm1 = vmmov 0  }
  0x3b   : > { %s2952_s13 = scalar_select %p439_p5, %s2887_s10, 1  ;;  %2612 = vset.pattern.permute.xlu1 %v2745_v2  ;;  %475 = vperm.xlu0 %2611, %v469_v15   ;;  %v466_v20 = vld [vmem:[%s3550_s2 + $0x8] sm:$0xff]  ;;  %v467_v21 = vld [vmem:[%s3550_s2 + $0x10] sm:$0xff]  ;;  %v468_v22 = vld [vmem:[%s3550_s2 + $0x18] sm:$0xff]  ;;  %vm704_vm2 = vcmask 15360   ;;  %vm717_vm3 = vcmask 1041408  }
  0x3c   : > { %485 = vperm.xlu1 %2612, %v471_v16   ;;  %2451 = vmatprep.mubr.msk.f32.mxu1 %vm2747_vm1, %v2744_v1  ;;  %v620_v16 = vld [vmem:[%s3552_s4] sm:$0x3]  ;;  %s2749_s30 = smov 49   ;;  %s2750_s17 = smov 50  }
  0x3d   : > { %s3564_s16 = sshll.u32 %s2952_s13, 6  ;;  %s3573_s29 = sshll.u32 %s2952_s13, 6 }
  0x3e   : > { %s448_s22 = scalar_lea.vmem %s3549_s1, %s3564_s16  ;;  %s2748_s13 = smov 51  }
  0x3f   : > { %v458_v3 = vld [vmem:[%s448_s22 + $0x8] sm:$0xff]  ;;  %v460_v4 = vld [vmem:[%s448_s22 + $0x18] sm:$0xff]  ;;  %v457_v5 = vld [vmem:[%s448_s22] sm:$0xff]  ;;  %480 = vperm.xlu0 %2611, %v470_v17   ;;  %s2751_s20 = smov 48   ;;  %s2752_s21 = smov 47  }
  0x40   : > { %v2462_v6 = vpack.c.bf16 %v460_v4, %v458_v3  ;;  %v459_v7 = vld [vmem:[%s448_s22 + $0x10] sm:$0xff]  ;;  %v462_v8 = vld [vmem:[%s448_s22 + $0x28] sm:$0xff]  ;;  %v464_v9 = vld [vmem:[%s448_s22 + $0x38] sm:$0xff]  ;;  %490 = vperm.xlu1 %2612, %v472_v18   ;;  %v2746_v4 = vmov 0.0|0.0   ;;  %s2753_s16 = smov 46   ;;  %s2754_s27 = smov 45  }
  0x41   : > { %v2464_v10 = vpack.c.bf16 %v459_v7, %v457_v5  ;;  %v2466_v11 = vpack.c.bf16 %v464_v9, %v462_v8  ;;  %v461_v12 = vld [vmem:[%s448_s22 + $0x20] sm:$0xff]  ;;  %v463_v13 = vld [vmem:[%s448_s22 + $0x30] sm:$0xff]  ;;  %s2997_s22 = scalar_lea.vmem %s3548_s0, %s3573_s29  ;;  %2470 = vmatprep.subr.bf16.mxu1 %v2746_v4  ;;  %s2755_s29 = smov 35  }
  0x42   : > { %2463 = vmatprep.subr.bf16.mxu0 %v2462_v6  ;;  %v2468_v14 = vpack.c.bf16 %v463_v13, %v461_v12  ;;  %v3000_v25 = vld [vmem:[%s2997_s22] sm:$0xff]  ;;  %v3005_v28 = vld [vmem:[%s2997_s22 + $0x8] sm:$0xff]  ;;  %v3014_v34 = vld [vmem:[%s2997_s22 + $0x10] sm:$0xff]  ;;  %s2756_s18 = smov 34   ;;  %s2757_s19 = smov 33  }
  0x43   : > { %2465 = vmatpush1.bf16.msra.mxu0 %v2464_v10  ;;  %v3019_v37 = vld [vmem:[%s2997_s22 + $0x18] sm:$0xff]  ;;  %v3030_v45 = vld [vmem:[%s2997_s22 + $0x20] sm:$0xff]  ;;  %v3037_v49 = vld [vmem:[%s2997_s22 + $0x28] sm:$0xff]  ;;  %p3574_p9 = scmp.ne.s32.totalorder %s3566_s14, 0 }
  0x44   : > { %2467 = vmatprep.subr.bf16.mxu0 %v2466_v11  ;;  %v3046_v56 = vld [vmem:[%s2997_s22 + $0x30] sm:$0xff]  ;;  %v3051_v59 = vld [vmem:[%s2997_s22 + $0x38] sm:$0xff]  ;;  %v696_v17 = vld [vmem:[%s3554_s6] sm:$0xff] }
  0x45   : > { %v2208_v5 = vld [vmem:[#allocation3] sm:$0x1]  ;;  %v833_v18 = vld [vmem:[%s3557_s9] sm:$0xff] }
  0x47   : > { %2469 = vmatpush1.bf16.msra.mxu0 %v2468_v14 }
  0x4a   : > { %2401 = vmatmul.mubr.msk.f32.vlgmr.msra.gmra.mrb[0].mxu0 %vm493_vm0, %v465_v19  ;;  %v834_v19 = vld [vmem:[%s3557_s9 + $0x8] sm:$0xff] }
  0x4b   : > { %576 = vmatprep.mubr.f32.mxu0 %v2744_v1 }
  0x4e   : > { %2402 = vmatmul.mubr.msk.f32.gmra.mrb[2].mxu0 %vm493_vm0, %v466_v20  ;;  %v835_v20 = vld [vmem:[%s3557_s9 + $0x10] sm:$0xff] }
  0x4f   : > { %582 = vmatprep.mubr.f32.mxu0 %v2744_v1 }
  0x52   : > { %2403 = vmatmul.mubr.msk.f32.gmra.mrb[4].mxu0 %vm493_vm0, %v467_v21  ;;  %v836_v21 = vld [vmem:[%s3557_s9 + $0x18] sm:$0xff] }
  0x53   : > { %588 = vmatprep.mubr.f32.mxu0 %v2744_v1 }
  0x56   : > { %2404 = vmatmul.mubr.msk.f32.gmra.mrb[6].mxu0 %vm493_vm0, %v468_v22  ;;  %v837_v22 = vld [vmem:[%s3557_s9 + $0x20] sm:$0xff] }
  0x57   : > { %925 = vmatprep.mubr.f32.mxu0 %v2744_v1 }
  0xba   : > { %v476_v23 = vpop.permute.xlu0 %475 }
  0xbb   : > { %v486_v38 = vpop.permute.xlu1 %485 }
  0xbe   : > { %v481_v30 = vpop.permute.xlu0 %480 }
  0xbf   : > { %v491_v53 = vpop.permute.xlu1 %490 }
 0x11d   : > { %v572_v24 = vpop.f32.mrb[0].mxu0 }
 0x11e   : > { %v3002_v26 = vadd.f32 %v572_v24, %v476_v23  ;;  %v574_v27 = vpop.f32.mrb[1].mxu0  ;;  %v839_v24 = vld [vmem:[%s3557_s9 + $0x30] sm:$0x1] }
 0x11f   : > { %v3007_v29 = vadd.f32 %v574_v27, %v476_v23  ;;  %v838_v23 = vld [vmem:[%s3557_s9 + $0x28] sm:$0xff]  ;;  %v621_v27 = vld [vmem:[%s3553_s5] sm:$0x3] }
 0x120   : > { %v595_v31 = vadd.f32 %v3002_v26, %v3000_v25 }
 0x121   : > { %v578_v32 = vpop.f32.mrb[2].mxu0  ;;  %v596_v33 = vadd.f32 %v3007_v29, %v3005_v28 }
 0x122   : > { %v3016_v35 = vadd.f32 %v578_v32, %v481_v30  ;;  %v580_v36 = vpop.f32.mrb[3].mxu0 }
 0x123   : > { %v3021_v39 = vadd.f32 %v580_v36, %v481_v30  ;;  %v603_v40 = vadd.f32 %v596_v33, %v595_v31  ;;  %v2484_v36 = vpack.c.bf16 %v3019_v37, %v3005_v28  ;;  %v699_v28 = vld [vmem:[%s3554_s6 + $0x18] sm:$0xff] }
 0x124   : > { %v597_v41 = vadd.f32 %v3016_v35, %v3014_v34  ;;  %v2478_v46 = vpack.c.bf16 %v3016_v35, %v3002_v26 }
 0x125   : > { %v584_v42 = vpop.f32.mrb[4].mxu0  ;;  %604 = vadd.xlane.f32.xlu0 %v603_v40  ;;  %v2476_v43 = vpack.c.bf16 %v3021_v39, %v3007_v29  ;;  %v598_v44 = vadd.f32 %v3021_v39, %v3019_v37  ;;  %v2486_v40 = vpack.c.bf16 %v3014_v34, %v3000_v25  ;;  %v2490_v25 = vpack.c.bf16 %v3046_v56, %v3030_v45  ;;  %v826_v34 = vld [vmem:[%s3556_s8] sm:$0xff]  ;;  %v827_v37 = vld [vmem:[%s3556_s8 + $0x8] sm:$0xff] }
 0x126   : > { %v3034_v47 = vadd.f32 %v584_v42, %v486_v38  ;;  %v586_v48 = vpop.f32.mrb[5].mxu0  ;;  %v2488_v42 = vpack.c.bf16 %v3051_v59, %v3037_v49 }
 0x127   : > { %v3039_v50 = vadd.f32 %v586_v48, %v486_v38  ;;  %2477 = vmatprep.subr.bf16.mxu0 %v2476_v43  ;;  %v606_v51 = vadd.f32 %v598_v44, %v597_v41  ;;  %v697_v38 = vld [vmem:[%s3554_s6 + $0x8] sm:$0xff]  ;;  %v698_v41 = vld [vmem:[%s3554_s6 + $0x10] sm:$0xff]  ;;  %v829_v44 = vld [vmem:[%s3556_s8 + $0x18] sm:$0xff] }
 0x128   : > { %2479 = vmatpush1.bf16.msra.mxu0 %v2478_v46  ;;  %v599_v52 = vadd.f32 %v3034_v47, %v3030_v45  ;;  %v828_v43 = vld [vmem:[%s3556_s8 + $0x10] sm:$0xff]  ;;  %v830_v45 = vld [vmem:[%s3556_s8 + $0x20] sm:$0xff]  ;;  %v831_v46 = vld [vmem:[%s3556_s8 + $0x28] sm:$0xff] }
 0x129   : > { %v590_v54 = vpop.f32.mrb[6].mxu0  ;;  %607 = vadd.xlane.f32.xlu1 %v606_v51  ;;  %v600_v55 = vadd.f32 %v3039_v50, %v3037_v49  ;;  %v832_v48 = vld [vmem:[%s3556_s8 + $0x30] sm:$0x1] }
 0x12a   : > { %v3048_v57 = vadd.f32 %v590_v54, %v491_v53  ;;  %v592_v58 = vpop.f32.mrb[7].mxu0 }
 0x12b   : > { %v3053_v60 = vadd.f32 %v592_v58, %v491_v53  ;;  %v609_v61 = vadd.f32 %v600_v55, %v599_v52 }
 0x12c   : > { %v601_v62 = vadd.f32 %v3048_v57, %v3046_v56  ;;  %v2482_v2 = vpack.c.bf16 %v3048_v57, %v3034_v47 }
 0x12d   : > { %610 = vadd.xlane.f32.xlu0 %v609_v61  ;;  %v2480_v63 = vpack.c.bf16 %v3053_v60, %v3039_v50  ;;  %v602_v0 = vadd.f32 %v3053_v60, %v3051_v59 }
 0x12f   : > { %2481 = vmatprep.subr.bf16.mxu0 %v2480_v63  ;;  %v612_v3 = vadd.f32 %v602_v0, %v601_v62 }
 0x130   : > { %2483 = vmatpush1.bf16.msra.mxu0 %v2482_v2 }
 0x131   : > { %613 = vadd.xlane.f32.xlu0 %v612_v3  ;;  %v1096_v3 = vld [vmem:[#allocation4] sm:$0xff] }
 0x133   : > { %2411 = vmatmul.mubr.msk.f32.vlgmr.msra.gmra.mrb[8].mxu0 %vm493_vm0, %v833_v18 }
 0x134   : > { %931 = vmatprep.mubr.f32.mxu0 %v2744_v1 }
 0x137   : > { %2412 = vmatmul.mubr.msk.f32.gmra.mrb[10].mxu0 %vm493_vm0, %v834_v19 }
 0x138   : > { %937 = vmatprep.mubr.f32.mxu0 %v2744_v1 }
 0x13b   : > { %2413 = vmatmul.mubr.msk.f32.gmra.mrb[12].mxu0 %vm493_vm0, %v835_v20 }
 0x13c   : > { %943 = vmatprep.mubr.f32.mxu0 %v2744_v1 }
 0x13f   : > { %2414 = vmatmul.mubr.msk.f32.gmra.mrb[14].mxu0 %vm493_vm0, %v836_v21  ;;  %v1100_v21 = vld [vmem:[#allocation4 + $0x20] sm:$0xff] }
 0x140   : > { %949 = vmatprep.mubr.f32.mxu0 %v2744_v1 }
 0x143   : > { %2415 = vmatmul.mubr.msk.f32.gmra.mrb[16].mxu0 %vm493_vm0, %v837_v22 }
 0x144   : > { %955 = vmatprep.mubr.f32.mxu0 %v2744_v1 }
 0x147   : > { %2211 = vperm.xlu0 %2611, %v2208_v5   ;;  %2416 = vmatmul.mubr.msk.f32.gmra.mrb[18].mxu0 %vm493_vm0, %v838_v23 }
 0x148   : > { %961 = vmatprep.mubr.f32.mxu0 %v2744_v1 }
 0x14b   : > { %2417 = vmatmul.mubr.msk.f32.gmra.mrb[20].mxu0 %vm493_vm0, %v839_v24  ;;  %v1101_v24 = vld [vmem:[#allocation4 + $0x28] sm:$0xff] }
 0x1b2   : > { %v605_v6 = vpop.xlane.xlu0 %604 }
 0x1b3   : > { %v616_v8 = vmul.f32 0.00390625, %v605_v6  ;;  %v1097_v6 = vld [vmem:[#allocation4 + $0x8] sm:$0xff] }
 0x1b6   : > { %v608_v7 = vpop.xlane.xlu1 %607 }
 0x1b7   : > { %v617_v9 = vmul.f32 0.00390625, %v608_v7 }
 0x1b9   : > { %v2471_v10 = vpack.c.bf16 %v617_v9, %v616_v8  ;;  %v1140_v9 = vlaneseq }
 0x1ba   : > { %v611_v11 = vpop.xlane.xlu0 %610 }
 0x1bb   : > { %2472 = vmatpush3.bf16.msra.mxu1 %v2471_v10  ;;  %v618_v13 = vmul.f32 0.00390625, %v611_v11  ;;  %v1141_v18 = vshrl.u32 %v1140_v9, 7 }
 0x1bc   : > { %2473 = vmatprep.subr.bf16.mxu1 %v2746_v4 }
 0x1be   : > { %v614_v12 = vpop.xlane.xlu0 %613 }
 0x1bf   : > { %v619_v14 = vmul.f32 0.00390625, %v614_v12  ;;  %v1098_v12 = vld [vmem:[#allocation4 + $0x10] sm:$0xff] }
 0x1c1   : > { %v2474_v15 = vpack.c.bf16 %v619_v14, %v618_v13 }
 0x1c3   : > { %2475 = vmatpush3.bf16.msra.mxu1 %v2474_v15  ;;  %v1099_v15 = vld [vmem:[#allocation4 + $0x18] sm:$0xff] }
 0x1c6   : > { %2452 = vmatmul.mubr.msk.f32.vlgmr.msra.gmra.mrb[0].mxu1 %vm493_vm0, %v620_v16 }
 0x1c7   : > { %2456 = vmatprep.mubr.msk.f32.mxu1 %vm704_vm2, %v696_v17 }
 0x206   : > { %v927_v49 = vpop.f32.mrb[8].mxu0 }
 0x207   : > { %v929_v51 = vpop.f32.mrb[9].mxu0 }
 0x20a   : > { %v933_v52 = vpop.f32.mrb[10].mxu0 }
 0x20b   : > { %v935_v53 = vpop.f32.mrb[11].mxu0 }
 0x20e   : > { %v939_v54 = vpop.f32.mrb[12].mxu0 }
 0x20f   : > { %v941_v55 = vpop.f32.mrb[13].mxu0 }
 0x212   : > { %v945_v56 = vpop.f32.mrb[14].mxu0 }
 0x213   : > { %v3164_v58 = vpop.f32.mrb[15].mxu0 }
 0x216   : > { %v3166_v59 = vpop.f32.mrb[16].mxu0 }
 0x299   : > { %v691_v30 = vpop.f32.mrb[0].mxu1 }
 0x29a   : > { %v692_v31 = vadd.f32 %v691_v30, %v621_v27  ;;  %v2453_v32 = vpop.f32.mrb[1].mxu1  ;;  %v3179_v27 = vsub.s32 1, %v1141_v18 }
 0x29b   : > { %v3181_v32 = vsub.s32 0, %v1141_v18 }
 0x29c   : > { %v695_v33 = vmax.f32 %v692_v31, 0.0 }
 0x29e   : > { %2454 = vmatprep.subr.msk.mxu1 %vm717_vm3, %v695_v33 }
 0x29f   : > { %2455 = vmatpush3.msk.msra.mxu1 %vm717_vm3, %v695_v33 }
 0x2a0   : > { %2457 = vmatmul.mubr.msk.f32.vlgmr.msra.gmra.mrb[2].mxu1 %vm704_vm2, %v697_v38  ;;  %2485 = vmatprep.subr.bf16.mxu1 %v2484_v36 }
 0x2a1   : > { %2487 = vmatpush1.bf16.msra.mxu1 %v2486_v40  ;;  %2459 = vmatprep.mubr.msk.f32.mxu1 %vm704_vm2, %v698_v41  ;;  %v1102_v41 = vld [vmem:[#allocation4 + $0x30] sm:$0xff] }
 0x2a2   : > { %2489 = vmatprep.subr.bf16.mxu1 %v2488_v42 }
 0x2a4   : > { %2460 = vmatmul.mubr.msk.f32.gmra.mrb[4].mxu1 %vm704_vm2, %v699_v28 }
 0x2a5   : > { %2491 = vmatpush1.bf16.msra.mxu1 %v2490_v25  ;;  %1053 = vmatprep.mubr.f32.mxu1 %v2744_v1 }
 0x2a8   : > { %2418 = vmatmul.mubr.msk.f32.vlgmr.msra.gmra.mrb[6].mxu1 %vm493_vm0, %v826_v34 }
 0x2a9   : > { %1059 = vmatprep.mubr.f32.mxu1 %v2744_v1 }
 0x2ac   : > { %2419 = vmatmul.mubr.msk.f32.gmra.mrb[8].mxu1 %vm493_vm0, %v827_v37 }
 0x2ad   : > { %1065 = vmatprep.mubr.f32.mxu1 %v2744_v1 }
 0x2b0   : > { %2420 = vmatmul.mubr.msk.f32.gmra.mrb[10].mxu1 %vm493_vm0, %v828_v43 }
 0x2b1   : > { %1071 = vmatprep.mubr.f32.mxu1 %v2744_v1 }
 0x2b4   : > { %2421 = vmatmul.mubr.msk.f32.gmra.mrb[12].mxu1 %vm493_vm0, %v829_v44 }
 0x2b5   : > { %1077 = vmatprep.mubr.f32.mxu1 %v2744_v1 }
 0x2b8   : > { %2422 = vmatmul.mubr.msk.f32.gmra.mrb[14].mxu1 %vm493_vm0, %v830_v45 }
 0x2b9   : > { %1083 = vmatprep.mubr.f32.mxu1 %v2744_v1 }
 0x2bc   : > { %2423 = vmatmul.mubr.msk.f32.gmra.mrb[16].mxu1 %vm493_vm0, %v831_v46 }
 0x2bd   : > { %1089 = vmatprep.mubr.f32.mxu1 %v2744_v1  ;;  %v3170_v1 = vpop.f32.mrb[17].mxu0 }
 0x2c0   : > { %2424 = vmatmul.mubr.msk.f32.gmra.mrb[18].mxu1 %vm493_vm0, %v832_v48 }
 0x373   : > { %v3168_v61 = vpop.f32.mrb[2].mxu1 }
 0x374   : > { %v3172_v62 = vpop.f32.mrb[3].mxu1 }
 0x377   : > { %v3174_v63 = vpop.f32.mrb[4].mxu1 }
 0x378   : > { %v3176_v0 = vpop.f32.mrb[5].mxu1 }
 0x37b   : > { %v1055_v2 = vpop.f32.mrb[6].mxu1 }
 0x37c   : > { %v1056_v4 = vadd.f32 %v1055_v2, %v927_v49  ;;  %v1057_v5 = vpop.f32.mrb[7].mxu1  ;;  %v1104_v2 = vld [vmem:[#allocation4 + $0x40] sm:$0xff] }
 0x37d   : > { %v1058_v7 = vadd.f32 %v1057_v5, %v929_v51 }
 0x37e   : > { %v1110_v8 = vmul.f32 %v1096_v3, %v1056_v4  ;;  %v957_v3 = vpop.f32.mrb[18].mxu0 }
 0x37f   : > { %v1111_v10 = vmul.f32 %v1097_v6, %v1058_v7  ;;  %v1061_v11 = vpop.f32.mrb[8].mxu1  ;;  %v1105_v7 = vld [vmem:[#allocation4 + $0x48] sm:$0xff] }
 0x380   : > { %1124 = vst [vmem:[#allocation2] sm:$0xff] %v1110_v8  ;;  %v1062_v13 = vadd.f32 %v1061_v11, %v933_v52  ;;  %v1063_v14 = vpop.f32.mrb[9].mxu1  ;;  %v1103_v52 = vld [vmem:[#allocation4 + $0x38] sm:$0xff]  ;;  %v959_v8 = vpop.f32.mrb[19].mxu0 }
 0x381   : > { %1125 = vst [vmem:[#allocation2 + $0x8] sm:$0xff] %v1111_v10  ;;  %v1064_v16 = vadd.f32 %v1063_v14, %v935_v53 }
 0x382   : > { %v1112_v17 = vmul.f32 %v1098_v12, %v1062_v13  ;;  %v1106_v12 = vld [vmem:[#allocation4 + $0x50] sm:$0xff] }
 0x383   : > { %v1113_v19 = vmul.f32 %v1099_v15, %v1064_v16  ;;  %v1067_v20 = vpop.f32.mrb[10].mxu1  ;;  %v1107_v16 = vld [vmem:[#allocation4 + $0x58] sm:$0xff] }
 0x384   : > { %1126 = vst [vmem:[#allocation2 + $0x10] sm:$0xff] %v1112_v17  ;;  %v1068_v22 = vadd.f32 %v1067_v20, %v939_v54  ;;  %v1069_v23 = vpop.f32.mrb[11].mxu1 }
 0x385   : > { %1127 = vst [vmem:[#allocation2 + $0x18] sm:$0xff] %v1113_v19  ;;  %v1070_v30 = vadd.f32 %v1069_v23, %v941_v55 }
 0x386   : > { %v1114_v31 = vmul.f32 %v1100_v21, %v1068_v22 }
 0x387   : > { %v1115_v33 = vmul.f32 %v1101_v24, %v1070_v30  ;;  %v1073_v36 = vpop.f32.mrb[12].mxu1 }
 0x388   : > { %v1138_v38 = vld [vmem:[#allocation2] ss:$8 sm:$0x3]  ;;  %1128 = vst [vmem:[#allocation2 + $0x20] sm:$0xff] %v1114_v31  ;;  %v1074_v40 = vadd.f32 %v1073_v36, %v945_v56  ;;  %v1075_v25 = vpop.f32.mrb[13].mxu1 }
 0x389   : > { %v1147_v42 = vrot.slane %v1138_v38, %v3179_v27  ;;  %v1143_v28 = vrot.slane %v1138_v38, %v3181_v32  ;;  %1129 = vst [vmem:[#allocation2 + $0x28] sm:$0xff] %v1115_v33  ;;  %v1182_v34 = vld [vmem:[#allocation2 + $0x2] ss:$8 sm:$0x3]  ;;  %v1076_v53 = vadd.f32 %v1075_v25, %v3164_v58 }
 0x38a   : > { %v1160_v37 = vld [vmem:[#allocation2 + $0x1] ss:$8 sm:$0x3]  ;;  %v1116_v43 = vmul.f32 %v1102_v41, %v1074_v40  ;;  %v1187_v44 = vrot.slane %v1182_v34, %v3181_v32  ;;  %v1204_v46 = vld [vmem:[#allocation2 + $0x3] ss:$8 sm:$0x3]  ;;  %v1191_v55 = vrot.slane %v1182_v34, %v3179_v27 }
 0x38b   : > { %1152 = vrot.lane.b32.xlu0 %v1147_v42, %s2748_s13  ;;  %1150 = vrot.lane.b32.xlu1 %v1143_v28, %s2748_s13  ;;  %v1165_v45 = vrot.slane %v1160_v37, %v3181_v32  ;;  %v1209_v48 = vrot.slane %v1204_v46, %v3181_v32  ;;  %v1169_v49 = vrot.slane %v1160_v37, %v3179_v27  ;;  %v1226_v51 = vld [vmem:[#allocation2 + $0x4] ss:$8 sm:$0x3]  ;;  %v1079_v56 = vpop.f32.mrb[14].mxu1  ;;  %s2758_s13 = smov 32  }
 0x38c   : > { %1130 = vst [vmem:[#allocation2 + $0x30] sm:$0xff] %v1116_v43  ;;  %v1231_v54 = vrot.slane %v1226_v51, %v3181_v32  ;;  %v1248_v4 = vld [vmem:[#allocation2 + $0x5] ss:$8 sm:$0x3]  ;;  %v1117_v5 = vmul.f32 %v1103_v52, %v1076_v53  ;;  %v1081_v6 = vpop.f32.mrb[15].mxu1  ;;  %v1080_v10 = vadd.f32 %v1079_v56, %v3166_v59  ;;  %v1213_v13 = vrot.slane %v1204_v46, %v3179_v27  ;;  %v963_v46 = vpop.f32.mrb[20].mxu0 }
 0x38d   : > { %v1082_v58 = vadd.f32 %v1081_v6, %v3170_v1  ;;  %v1253_v17 = vrot.slane %v1248_v4, %v3181_v32  ;;  %v1270_v21 = vld [vmem:[#allocation2 + $0x6] ss:$8 sm:$0x3]  ;;  %v1235_v23 = vrot.slane %v1226_v51, %v3179_v27  ;;  %v1292_v24 = vld [vmem:[#allocation2 + $0x7] ss:$8 sm:$0x3]  ;;  %v1257_v33 = vrot.slane %v1248_v4, %v3179_v27 }
 0x38e   : > { %1131 = vst [vmem:[#allocation2 + $0x38] sm:$0xff] %v1117_v5  ;;  %v1118_v18 = vmul.f32 %v1104_v2, %v1080_v10  ;;  %v1275_v1 = vrot.slane %v1270_v21, %v3181_v32  ;;  %v1312_v30 = vld [vmem:[#allocation2 + $0x10] ss:$8 sm:$0x3]  ;;  %v1297_v31 = vrot.slane %v1292_v24, %v3181_v32  ;;  %v1279_v40 = vrot.slane %v1270_v21, %v3179_v27  ;;  %v965_v52 = vpop.f32.mrb[21].mxu0 }
 0x38f   : > { %1194 = vrot.lane.b32.xlu0 %v1187_v44, %s2749_s30  ;;  %1172 = vrot.lane.b32.xlu1 %v1165_v45, %s2750_s17  ;;  %v1085_v11 = vpop.f32.mrb[16].mxu1  ;;  %v1119_v19 = vmul.f32 %v1105_v7, %v1082_v58  ;;  %v1317_v36 = vrot.slane %v1312_v30, %v3181_v32  ;;  %v1334_v38 = vld [vmem:[#allocation2 + $0x11] ss:$8 sm:$0x3]  ;;  %v1301_v28 = vrot.slane %v1292_v24, %v3179_v27 }
 0x390   : > { %v1086_v14 = vadd.f32 %v1085_v11, %v957_v3  ;;  %v1087_v15 = vpop.f32.mrb[17].mxu1  ;;  %1132 = vst [vmem:[#allocation2 + $0x40] sm:$0xff] %v1118_v18  ;;  %v1339_v41 = vrot.slane %v1334_v38, %v3181_v32  ;;  %v1356_v42 = vld [vmem:[#allocation2 + $0x12] ss:$8 sm:$0x3]  ;;  %v1321_v34 = vrot.slane %v1312_v30, %v3179_v27  ;;  %v1343_v44 = vrot.slane %v1334_v38, %v3179_v27 }
 0x391   : > { %v1088_v20 = vadd.f32 %v1087_v15, %v959_v8  ;;  %1133 = vst [vmem:[#allocation2 + $0x48] sm:$0xff] %v1119_v19  ;;  %v1361_v25 = vrot.slane %v1356_v42, %v3181_v32  ;;  %v1378_v37 = vld [vmem:[#allocation2 + $0x13] ss:$8 sm:$0x3]  ;;  %v1365_v56 = vrot.slane %v1356_v42, %v3179_v27 }
 0x392   : > { %v1120_v22 = vmul.f32 %v1106_v12, %v1086_v14  ;;  %v1383_v43 = vrot.slane %v1378_v37, %v3181_v32  ;;  %v1400_v45 = vld [vmem:[#allocation2 + $0x14] ss:$8 sm:$0x3]  ;;  %v1422_v3 = vld [vmem:[#allocation2 + $0x15] ss:$8 sm:$0x3]  ;;  %v1387_v7 = vrot.slane %v1378_v37, %v3179_v27 }
 0x393   : > { %1216 = vrot.lane.b32.xlu0 %v1209_v48, %s2751_s20  ;;  %1174 = vrot.lane.b32.xlu1 %v1169_v49, %s2750_s17  ;;  %v1121_v59 = vmul.f32 %v1107_v16, %v1088_v20  ;;  %v1091_v48 = vpop.f32.mrb[18].mxu1  ;;  %v1108_v49 = vld [vmem:[#allocation4 + $0x60] sm:$0x1]  ;;  %s2760_s17 = smov 30   ;;  %v1427_v6 = vrot.slane %v1422_v3, %v3181_v32  ;;  %v1409_v58 = vrot.slane %v1400_v45, %v3179_v27 }
 0x394   : > { %1134 = vst [vmem:[#allocation2 + $0x50] sm:$0xff] %v1120_v22  ;;  %v1092_v51 = vadd.f32 %v1091_v48, %v963_v46  ;;  %v1093_v53 = vpop.f32.mrb[19].mxu1  ;;  %v1444_v8 = vld [vmem:[#allocation2 + $0x16] ss:$8 sm:$0x3]  ;;  %v1431_v14 = vrot.slane %v1422_v3, %v3179_v27 }
 0x395   : > { %1135 = vst [vmem:[#allocation2 + $0x58] sm:$0xff] %v1121_v59  ;;  %v1094_v2 = vadd.f32 %v1093_v53, %v965_v52  ;;  %v1449_v10 = vrot.slane %v1444_v8, %v3181_v32  ;;  %v1464_v11 = vld [vmem:[#allocation2 + $0x17] ss:$8 sm:$0x3] }
 0x396   : > { %v1122_v4 = vmul.f32 %v1108_v49, %v1092_v51  ;;  %v1486_v12 = vld [vmem:[#allocation2 + $0x20] ss:$8 sm:$0x3]  ;;  %v1508_v16 = vld [vmem:[#allocation2 + $0x21] ss:$8 sm:$0x3]  ;;  %v1473_v20 = vrot.slane %v1464_v11, %v3179_v27 }
 0x397   : > { %1238 = vrot.lane.b32.xlu0 %v1231_v54, %s2752_s21  ;;  %1196 = vrot.lane.b32.xlu1 %v1191_v55, %s2749_s30  ;;  %s2759_s30 = smov 31   ;;  %v1109_v54 = vld [vmem:[#allocation4 + $0x68] sm:$0x1]  ;;  %v1405_v55 = vrot.slane %v1400_v45, %v3181_v32  ;;  %v1491_v15 = vrot.slane %v1486_v12, %v3181_v32  ;;  %v1513_v18 = vrot.slane %v1508_v16, %v3181_v32  ;;  %v1530_v19 = vld [vmem:[#allocation2 + $0x22] ss:$8 sm:$0x3] }
 0x398   : > { %v1123_v5 = vmul.f32 %v1109_v54, %v1094_v2  ;;  %1136 = vst [vmem:[#allocation2 + $0x60] sm:$0x1] %v1122_v4  ;;  %v1535_v21 = vrot.slane %v1530_v19, %v3181_v32  ;;  %v1495_v22 = vrot.slane %v1486_v12, %v3179_v27  ;;  %v1552_v59 = vld [vmem:[#allocation2 + $0x23] ss:$8 sm:$0x3] }
 0x399   : > { %v1574_v24 = vld [vmem:[#allocation2 + $0x24] ss:$8 sm:$0x3]  ;;  %v1561_v38 = vrot.slane %v1552_v59, %v3179_v27  ;;  %v1761_v48 = vld [vmem:[#allocation2 + $0x35] ss:$8 sm:$0x3] }
 0x39a   : > { %1137 = vst [vmem:[#allocation2 + $0x68] sm:$0x1] %v1123_v5  ;;  %v1579_v30 = vrot.slane %v1574_v24, %v3181_v32  ;;  %v1583_v42 = vrot.slane %v1574_v24, %v3179_v27  ;;  %v1770_v51 = vrot.slane %v1761_v48, %v3179_v27  ;;  %v1783_v53 = vld [vmem:[#allocation2 + $0x36] ss:$8 sm:$0x3]  ;;  %v3249_v5 = vpop.permute.xlu0 %2211 }
 0x39b   : > { %1260 = vrot.lane.b32.xlu0 %v1253_v17, %s2753_s16  ;;  %1218 = vrot.lane.b32.xlu1 %v1213_v13, %s2751_s20  ;;  %s2761_s20 = smov 29   ;;  %v1469_v13 = vrot.slane %v1464_v11, %v3181_v32  ;;  %v1453_v17 = vrot.slane %v1444_v8, %v3179_v27  ;;  %v1792_v54 = vrot.slane %v1783_v53, %v3179_v27  ;;  %v1697_v4 = vld [vmem:[#allocation2 + $0x32] ss:$8 sm:$0x3] }
 0x39c   : > { %v1788_v3 = vrot.slane %v1783_v53, %v3181_v32  ;;  %v1719_v8 = vld [vmem:[#allocation2 + $0x33] ss:$8 sm:$0x3] }
 0x39d   : > { %v1724_v12 = vrot.slane %v1719_v8, %v3181_v32 }
 0x39f   : > { %1282 = vrot.lane.b32.xlu0 %v1275_v1, %s2754_s27  ;;  %1240 = vrot.lane.b32.xlu1 %v1235_v23, %s2752_s21  ;;  %s2762_s21 = smov 19   ;;  %v1557_v1 = vrot.slane %v1552_v59, %v3181_v32  ;;  %v1517_v23 = vrot.slane %v1508_v16, %v3179_v27  ;;  %v1913_v16 = vld [vmem:[#allocation2 + $0x44] ss:$8 sm:$0x3]  ;;  %v1728_v59 = vrot.slane %v1719_v8, %v3179_v27 }
 0x3a3   : > { %1304 = vrot.lane.b32.xlu0 %v1297_v31, %s2755_s29  ;;  %1262 = vrot.lane.b32.xlu1 %v1257_v33, %s2753_s16  ;;  %s2763_s16 = smov 18   ;;  %v1539_v31 = vrot.slane %v1530_v19, %v3179_v27  ;;  %v1596_v33 = vld [vmem:[#allocation2 + $0x25] ss:$8 sm:$0x3]  ;;  %v1706_v19 = vrot.slane %v1697_v4, %v3179_v27 }
 0x3a4   : > { %v1605_v37 = vrot.slane %v1596_v33, %v3179_v27 }
 0x3a7   : > { %1324 = vrot.lane.b32.xlu0 %v1317_v36, %s2756_s18  ;;  %1284 = vrot.lane.b32.xlu1 %v1279_v40, %s2754_s27  ;;  %s2764_s27 = smov 17   ;;  %v1601_v36 = vrot.slane %v1596_v33, %v3181_v32  ;;  %v1616_v40 = vld [vmem:[#allocation2 + $0x26] ss:$8 sm:$0x3] }
 0x3a8   : > { %v1625_v45 = vrot.slane %v1616_v40, %v3179_v27 }
 0x3ab   : > { %1346 = vrot.lane.b32.xlu0 %v1339_v41, %s2757_s19  ;;  %1306 = vrot.lane.b32.xlu1 %v1301_v28, %s2755_s29  ;;  %s2765_s29 = smov 16   ;;  %v1621_v41 = vrot.slane %v1616_v40, %v3181_v32  ;;  %v1638_v28 = vld [vmem:[#allocation2 + $0x27] ss:$8 sm:$0x3] }
 0x3ac   : > { %v1647_v49 = vrot.slane %v1638_v28, %v3179_v27 }
 0x3af   : > { %1368 = vrot.lane.b32.xlu0 %v1361_v25, %s2758_s13  ;;  %1326 = vrot.lane.b32.xlu1 %v1321_v34, %s2756_s18  ;;  %s2766_s18 = smov 15   ;;  %v1675_v25 = vld [vmem:[#allocation2 + $0x31] ss:$8 sm:$0x3]  ;;  %v1643_v34 = vrot.slane %v1638_v28, %v3181_v32 }
 0x3b3   : > { %1390 = vrot.lane.b32.xlu0 %v1383_v43, %s2759_s30  ;;  %1348 = vrot.lane.b32.xlu1 %v1343_v44, %s2757_s19  ;;  %s2767_s19 = smov 14   ;;  %v1680_v43 = vrot.slane %v1675_v25, %v3181_v32  ;;  %v1741_v44 = vld [vmem:[#allocation2 + $0x34] ss:$8 sm:$0x3] }
 0x3b4   : > { %v1750_v46 = vrot.slane %v1741_v44, %v3179_v27  ;;  %v1746_v52 = vrot.slane %v1741_v44, %v3181_v32 }
 0x3b7   : > { %1412 = vrot.lane.b32.xlu0 %v1405_v55, %s2760_s17  ;;  %1370 = vrot.lane.b32.xlu1 %v1365_v56, %s2758_s13  ;;  %s2768_s13 = smov 13   ;;  %v1766_v55 = vrot.slane %v1761_v48, %v3181_v32  ;;  %v1805_v56 = vld [vmem:[#allocation2 + $0x37] ss:$8 sm:$0x3] }
 0x3b8   : > { %v1814_v2 = vrot.slane %v1805_v56, %v3179_v27 }
 0x3bb   : > { %1434 = vrot.lane.b32.xlu0 %v1427_v6, %s2761_s20  ;;  %1392 = vrot.lane.b32.xlu1 %v1387_v7, %s2759_s30  ;;  %s2769_s30 = smov 3   ;;  %v1702_v6 = vrot.slane %v1697_v4, %v3181_v32  ;;  %v1810_v7 = vrot.slane %v1805_v56, %v3181_v32 }
 0x3bf   : > { %1456 = vrot.lane.b32.xlu0 %v1449_v10, %s2762_s21  ;;  %1414 = vrot.lane.b32.xlu1 %v1409_v58, %s2760_s17  ;;  %s2770_s17 = smov 2   ;;  %v1893_v10 = vld [vmem:[#allocation2 + $0x43] ss:$8 sm:$0x3] }
 0x3c3   : > { %1476 = vrot.lane.b32.xlu0 %v1469_v13, %s2763_s16  ;;  %1436 = vrot.lane.b32.xlu1 %v1431_v14, %s2761_s20  ;;  %s2771_s20 = smov 1   ;;  %v1684_v13 = vrot.slane %v1675_v25, %v3179_v27  ;;  %v3256_v14 = vand.u32 127, %v1140_v9  ;;  %v1922_v9 = vrot.slane %v1913_v16, %v3179_v27  ;;  %v1957_v25 = vld [vmem:[#allocation2 + $0x46] ss:$8 sm:$0x3] }
 0x3c5   : > { %vm1156_vm4 = vcmp.lt.s32.totalorder %v3256_v14, 51  ;;  %vm1176_vm5 = vcmp.lt.s32.totalorder %v3256_v14, 50  ;;  %vm1198_vm6 = vcmp.lt.s32.totalorder %v3256_v14, 49  ;;  %vm1220_vm7 = vcmp.lt.s32.totalorder %v3256_v14, 48 }
 0x3c6   : > { %vm1242_vm8 = vcmp.lt.s32.totalorder %v3256_v14, 47  ;;  %vm1264_vm9 = vcmp.lt.s32.totalorder %v3256_v14, 46  ;;  %vm1286_vm10 = vcmp.lt.s32.totalorder %v3256_v14, 45  ;;  %vm1308_vm11 = vcmp.lt.s32.totalorder %v3256_v14, 35 }
 0x3c7   : > { %1498 = vrot.lane.b32.xlu0 %v1491_v15, %s2764_s27  ;;  %1458 = vrot.lane.b32.xlu1 %v1453_v17, %s2762_s21  ;;  %s2772_s21 = smov 127   ;;  %v1902_v15 = vrot.slane %v1893_v10, %v3179_v27  ;;  %vm1328_vm12 = vcmp.lt.s32.totalorder %v3256_v14, 34  ;;  %vm1350_vm13 = vcmp.lt.s32.totalorder %v3256_v14, 33  ;;  %vm1372_vm14 = vcmp.lt.s32.totalorder %v3256_v14, 32 }
 0x3c8   : > { %vm1394_vm15 = vcmp.lt.s32.totalorder %v3256_v14, 31  ;;  %vm1416_vm0 = vcmp.lt.s32.totalorder %v3256_v14, 30  ;;  %vm1438_vm1 = vcmp.lt.s32.totalorder %v3256_v14, 29  ;;  %vm1460_vm2 = vcmp.lt.s32.totalorder %v3256_v14, 19 }
 0x3c9   : > { %vm1480_vm3 = vcmp.lt.s32.totalorder %v3256_v14, 18 }
 0x3cb   : > { %1520 = vrot.lane.b32.xlu0 %v1513_v18, %s2765_s29  ;;  %1478 = vrot.lane.b32.xlu1 %v1473_v20, %s2763_s16  ;;  %s2773_s16 = smov 115   ;;  %v1935_v20 = vld [vmem:[#allocation2 + $0x45] ss:$8 sm:$0x3] }
 0x3cf   : > { %1542 = vrot.lane.b32.xlu0 %v1535_v21, %s2766_s18  ;;  %1500 = vrot.lane.b32.xlu1 %v1495_v22, %s2764_s27  ;;  %s2774_s27 = smov 114  }
 0x3d3   : > { %1564 = vrot.lane.b32.xlu0 %v1557_v1, %s2767_s19  ;;  %1522 = vrot.lane.b32.xlu1 %v1517_v23, %s2765_s29  ;;  %v1944_v1 = vrot.slane %v1935_v20, %v3179_v27 }
 0x3d7   : > { %1586 = vrot.lane.b32.xlu0 %v1579_v30, %s2768_s13  ;;  %1544 = vrot.lane.b32.xlu1 %v1539_v31, %s2766_s18  ;;  %s2775_s18 = smov 113  }
 0x3db   : > { %1608 = vrot.lane.b32.xlu0 %v1601_v36, %s2769_s30  ;;  %1566 = vrot.lane.b32.xlu1 %v1561_v38, %s2767_s19  ;;  %s2776_s19 = smov 112   ;;  %v1898_v38 = vrot.slane %v1893_v10, %v3181_v32 }
 0x3df   : > { %1628 = vrot.lane.b32.xlu0 %v1621_v41, %s2770_s17  ;;  %1588 = vrot.lane.b32.xlu1 %v1583_v42, %s2768_s13  ;;  %s2777_s13 = smov 126  }
 0x3e3   : > { %1650 = vrot.lane.b32.xlu0 %v1643_v34, %s2771_s20  ;;  %1610 = vrot.lane.b32.xlu1 %v1605_v37, %s2769_s30  ;;  %s2778_s30 = smov 125  }
 0x3e7   : > { %1687 = vrot.lane.b32.xlu0 %v1680_v43, %s2772_s21  ;;  %1630 = vrot.lane.b32.xlu1 %v1625_v45, %s2770_s17  ;;  %s2779_s17 = smov 99   ;;  %v1966_v45 = vrot.slane %v1957_v25, %v3179_v27 }
 0x3eb   : > { %1755 = vrot.lane.b32.xlu0 %v1750_v46, %s2773_s16  ;;  %1652 = vrot.lane.b32.xlu1 %v1647_v49, %s2771_s20  ;;  %s2780_s20 = smov 98   ;;  %v1918_v46 = vrot.slane %v1913_v16, %v3181_v32  ;;  %v1849_v16 = vld [vmem:[#allocation2 + $0x41] ss:$8 sm:$0x3] }
 0x3ef   : > { %1775 = vrot.lane.b32.xlu0 %v1770_v51, %s2774_s27  ;;  %1753 = vrot.lane.b32.xlu1 %v1746_v52, %s2773_s16  ;;  %v1827_v51 = vld [vmem:[#allocation2 + $0x40] ss:$8 sm:$0x3]  ;;  %s2782_s16 = smov 96  }
 0x3f0   : > { %v1832_v56 = vrot.slane %v1827_v51, %v3181_v32 }
 0x3f3   : > { %1797 = vrot.lane.b32.xlu0 %v1792_v54, %s2775_s18  ;;  %1773 = vrot.lane.b32.xlu1 %v1766_v55, %s2774_s27  ;;  %s2783_s27 = smov 111  }
 0x3f7   : > { %1819 = vrot.lane.b32.xlu0 %v1814_v2, %s2776_s19  ;;  %1795 = vrot.lane.b32.xlu1 %v1788_v3, %s2775_s18  ;;  %v1940_v2 = vrot.slane %v1935_v20, %v3181_v32  ;;  %s2784_s18 = smov 95  }
 0x3fb   : > { %1709 = vrot.lane.b32.xlu0 %v1702_v6, %s2777_s13  ;;  %1817 = vrot.lane.b32.xlu1 %v1810_v7, %s2776_s19  ;;  %v1979_v6 = vld [vmem:[#allocation2 + $0x47] ss:$8 sm:$0x3]  ;;  %s2795_s19 = smov 77  }
 0x3fd   : > { %v1151_v58 = vpop.permute.xlu1 %1150  ;;  %v1153_v11 = vpop.permute.xlu0 %1152 }
 0x3fe   : > { %v1157_v23 = vsel %vm1156_vm4, %v1151_v58, %v1153_v11  ;;  %v1158_v24 = vsel %vm1156_vm4, %v1153_v11, %v1151_v58  ;;  %v1984_v11 = vrot.slane %v1979_v6, %v3181_v32  ;;  %vm1502_vm4 = vcmp.lt.s32.totalorder %v3256_v14, 17 }
 0x3ff   : > { %1731 = vrot.lane.b32.xlu0 %v1724_v12, %s2778_s30  ;;  %1689 = vrot.lane.b32.xlu1 %v1684_v13, %s2772_s21  ;;  %s2781_s21 = smov 97   ;;  %v1962_v12 = vrot.slane %v1957_v25, %v3181_v32  ;;  %v703_v25 = vld [vmem:[%s3555_s7 + $0x18] sm:$0xff] }
 0x401   : > { %v1173_v17 = vpop.permute.xlu1 %1172  ;;  %v1195_v18 = vpop.permute.xlu0 %1194 }
 0x403   : > { %1907 = vrot.lane.b32.xlu0 %v1902_v15, %s2779_s17  ;;  %1711 = vrot.lane.b32.xlu1 %v1706_v19, %s2777_s13  ;;  %s436_s13 = sand.u32 1, %s2731_s24  }
 0x405   : > { %v1175_v21 = vpop.permute.xlu1 %1174  ;;  %v1217_v22 = vpop.permute.xlu0 %1216 }
 0x406   : > { %v1177_v30 = vsel %vm1176_vm5, %v1173_v17, %v1175_v21  ;;  %v1178_v31 = vsel %vm1176_vm5, %v1175_v21, %v1173_v17  ;;  %v1836_v21 = vrot.slane %v1827_v51, %v3179_v27  ;;  %vm1524_vm5 = vcmp.lt.s32.totalorder %v3256_v14, 16 }
 0x407   : > { %v1179_v33 = vadd.f32 %v1178_v31, %v1158_v24  ;;  %v1180_v36 = vadd.f32 %v1177_v30, %v1157_v23  ;;  %1927 = vrot.lane.b32.xlu0 %v1922_v9, %s2780_s20  ;;  %1733 = vrot.lane.b32.xlu1 %v1728_v59, %s2778_s30  ;;  %v1854_v9 = vrot.slane %v1849_v16, %v3181_v32  ;;  %v1871_v23 = vld [vmem:[#allocation2 + $0x42] ss:$8 sm:$0x3]  ;;  %s2785_s30 = smov 110  }
 0x408   : > { %v2045_v31 = vld [vmem:[#allocation2 + $0x52] ss:$8 sm:$0x3] }
 0x409   : > { %v1197_v40 = vpop.permute.xlu1 %1196  ;;  %v1239_v41 = vpop.permute.xlu0 %1238 }
 0x40a   : > { %v1199_v42 = vsel %vm1198_vm6, %v1195_v18, %v1197_v40  ;;  %v1200_v28 = vsel %vm1198_vm6, %v1197_v40, %v1195_v18  ;;  %v1876_v40 = vrot.slane %v1871_v23, %v3181_v32  ;;  %vm1546_vm6 = vcmp.lt.s32.totalorder %v3256_v14, 15 }
 0x40b   : > { %v1201_v34 = vadd.f32 %v1200_v28, %v1179_v33  ;;  %v1202_v37 = vadd.f32 %v1199_v42, %v1180_v36  ;;  %1949 = vrot.lane.b32.xlu0 %v1944_v1, %s2781_s21  ;;  %1905 = vrot.lane.b32.xlu1 %v1898_v38, %s2779_s17  ;;  %s2789_s17 = smov 81  }
 0x40d   : > { %v1219_v43 = vpop.permute.xlu1 %1218  ;;  %v1261_v44 = vpop.permute.xlu0 %1260 }
 0x40e   : > { %v1221_v48 = vsel %vm1220_vm7, %v1217_v22, %v1219_v43  ;;  %v1222_v49 = vsel %vm1220_vm7, %v1219_v43, %v1217_v22  ;;  %v701_v22 = vld [vmem:[%s3555_s7 + $0x8] sm:$0xff]  ;;  %vm1568_vm7 = vcmp.lt.s32.totalorder %v3256_v14, 14 }
 0x40f   : > { %v1223_v52 = vadd.f32 %v1222_v49, %v1201_v34  ;;  %v1224_v53 = vadd.f32 %v1221_v48, %v1202_v37  ;;  %1971 = vrot.lane.b32.xlu0 %v1966_v45, %s2782_s16  ;;  %1925 = vrot.lane.b32.xlu1 %v1918_v46, %s2780_s20  ;;  %v793_v33 = vadd.f32 %v3168_v61, %v701_v22  ;;  %v3298_v34 = vld [vmem:[#allocation2 + $0x53] ss:$8 sm:$0x3]  ;;  %v700_v46 = vld [vmem:[%s3555_s7] sm:$0xff]  ;;  %s2790_s20 = smov 80  }
 0x410   : > { %v2054_v61 = vrot.slane %v2045_v31, %v3179_v27  ;;  %v1858_v45 = vrot.slane %v1849_v16, %v3179_v27  ;;  %v803_v48 = vadd.f32 %v3174_v63, %v703_v25 }
 0x411   : > { %v1241_v54 = vpop.permute.xlu1 %1240  ;;  %v1283_v55 = vpop.permute.xlu0 %1282  ;;  %v807_v37 = vsub.f32 0.0, %v793_v33 }
 0x412   : > { %v1243_v3 = vsel %vm1242_vm8, %v1239_v41, %v1241_v54  ;;  %v1244_v4 = vsel %vm1242_vm8, %v1241_v54, %v1239_v41  ;;  %v1988_v41 = vrot.slane %v1979_v6, %v3179_v27  ;;  %v2074_v54 = vrot.slane %v3298_v34, %v3179_v27 }
 0x413   : > { %v1245_v7 = vadd.f32 %v1244_v4, %v1223_v52  ;;  %v1246_v8 = vadd.f32 %v1243_v3, %v1224_v53  ;;  %1839 = vrot.lane.b32.xlu0 %v1832_v56, %s2783_s27  ;;  %1947 = vrot.lane.b32.xlu1 %v1940_v2, %s2781_s21  ;;  %s2786_s21 = smov 109   ;;  %v812_v56 = vmul.f32 1.442695, %v807_v37  ;;  %v788_v2 = vadd.f32 %v3172_v62, %v700_v46 }
 0x414   : > { %v1880_v4 = vrot.slane %v1871_v23, %v3179_v27  ;;  %v809_v6 = vsub.f32 0.0, %v803_v48  ;;  %vm1590_vm8 = vcmp.lt.s32.totalorder %v3256_v14, 13 }
 0x415   : > { %v1263_v10 = vpop.permute.xlu1 %1262  ;;  %v1305_v58 = vpop.permute.xlu0 %1304  ;;  %2613 = vpow2.f32 %v812_v56 }
 0x416   : > { %v1265_v13 = vsel %vm1264_vm9, %v1261_v44, %v1263_v10  ;;  %v1266_v15 = vsel %vm1264_vm9, %v1263_v10, %v1261_v44  ;;  %v2050_v10 = vrot.slane %v2045_v31, %v3181_v32  ;;  %vm1612_vm9 = vcmp.lt.s32.totalorder %v3256_v14, 3 }
 0x417   : > { %v1267_v17 = vadd.f32 %v1266_v15, %v1245_v7  ;;  %v1268_v18 = vadd.f32 %v1265_v13, %v1246_v8  ;;  %1991 = vrot.lane.b32.xlu0 %v1984_v11, %s2784_s18  ;;  %1969 = vrot.lane.b32.xlu1 %v1962_v12, %s2782_s16  ;;  %v806_v13 = vsub.f32 0.0, %v788_v2  ;;  %v2023_v2 = vld [vmem:[#allocation2 + $0x51] ss:$8 sm:$0x3]  ;;  %s2792_s16 = smov 79  }
 0x419   : > { %v1285_v19 = vpop.permute.xlu1 %1284  ;;  %v1325_v20 = vpop.permute.xlu0 %1324  ;;  %v810_v31 = vmul.f32 1.442695, %v806_v13 }
 0x41a   : > { %v1287_v59 = vsel %vm1286_vm10, %v1283_v55, %v1285_v19  ;;  %v1288_v1 = vsel %vm1286_vm10, %v1285_v19, %v1283_v55  ;;  %v2087_v55 = vld [vmem:[#allocation2 + $0x54] ss:$8 sm:$0x3]  ;;  %vm1632_vm10 = vcmp.lt.s32.totalorder %v3256_v14, 2 }
 0x41b   : > { %v3283_v24 = vadd.f32 %v1288_v1, %v1267_v17  ;;  %v3285_v30 = vadd.f32 %v1287_v59, %v1268_v18  ;;  %1861 = vrot.lane.b32.xlu0 %v1854_v9, %s2785_s30  ;;  %1841 = vrot.lane.b32.xlu1 %v1836_v21, %s2783_s27  ;;  %v2096_v62 = vrot.slane %v2087_v55, %v3179_v27  ;;  %v816_v9 = vmul.f32 1.442695, %v809_v6  ;;  %s2793_s27 = smov 93  }
 0x41d   : > { %v1307_v36 = vpop.permute.xlu1 %1306  ;;  %v1347_v38 = vpop.permute.xlu0 %1346  ;;  %2615 = vpow2.f32 %v816_v9 }
 0x41e   : > { %v1309_v42 = vsel %vm1308_vm11, %v1305_v58, %v1307_v36  ;;  %v1310_v28 = vsel %vm1308_vm11, %v1307_v36, %v1305_v58  ;;  %v702_v58 = vld [vmem:[%s3555_s7 + $0x10] sm:$0xff]  ;;  %2617 = vpow2.f32 %v810_v31  ;;  %vm1654_vm11 = vcmp.lt.s32.totalorder %v3256_v14, 1 }
 0x41f   : > { %1883 = vrot.lane.b32.xlu0 %v1876_v40, %s2786_s21  ;;  %1993 = vrot.lane.b32.xlu1 %v1988_v41, %s2784_s18  ;;  %s2787_s18 = smov 83   ;;  %v798_v17 = vadd.f32 %v3176_v0, %v702_v58  ;;  %v2070_v0 = vrot.slane %v3298_v34, %v3181_v32  ;;  %v2001_v40 = vld [vmem:[#allocation2 + $0x50] ss:$8 sm:$0x3]  ;;  %v2092_v34 = vrot.slane %v2087_v55, %v3181_v32 }
 0x421   : > { %v1327_v43 = vpop.permute.xlu1 %1326  ;;  %v1369_v44 = vpop.permute.xlu0 %1368  ;;  %v808_v33 = vsub.f32 0.0, %v798_v17 }
 0x422   : > { %v1329_v49 = vsel %vm1328_vm12, %v1325_v20, %v1327_v43  ;;  %v1330_v51 = vsel %vm1328_vm12, %v1327_v43, %v1325_v20  ;;  %v2109_v20 = vld [vmem:[#allocation2 + $0x55] ss:$8 sm:$0x3]  ;;  %vm1757_vm12 = vcmp.lt.s32.totalorder %v3256_v14, 115 }
 0x423   : > { %v1331_v52 = vadd.f32 %v1330_v51, %v1310_v28  ;;  %v1332_v53 = vadd.f32 %v1329_v49, %v1309_v42  ;;  %2059 = vrot.lane.b32.xlu0 %v2054_v61, %s2787_s18  ;;  %1863 = vrot.lane.b32.xlu1 %v1858_v45, %s2785_s30  ;;  %s2788_s30 = smov 82   ;;  %v2114_v23 = vrot.slane %v2109_v20, %v3181_v32  ;;  %v814_v45 = vmul.f32 1.442695, %v808_v33  ;;  %v2614_v49 = vpop.eup %2613 }
 0x424   : > { %v2006_v61 = vrot.slane %v2001_v40, %v3181_v32 }
 0x425   : > { %v1349_v3 = vpop.permute.xlu1 %1348  ;;  %v1391_v63 = vpop.permute.xlu0 %1390  ;;  %2619 = vpow2.f32 %v814_v45 }
 0x426   : > { %v1351_v7 = vsel %vm1350_vm13, %v1347_v38, %v1349_v3  ;;  %v1352_v8 = vsel %vm1350_vm13, %v1349_v3, %v1347_v38  ;;  %vm1777_vm13 = vcmp.lt.s32.totalorder %v3256_v14, 114 }
 0x427   : > { %v1353_v11 = vadd.f32 %v1352_v8, %v1331_v52  ;;  %v1354_v12 = vadd.f32 %v1351_v7, %v1332_v53  ;;  %2079 = vrot.lane.b32.xlu0 %v2074_v54, %s2788_s30  ;;  %1885 = vrot.lane.b32.xlu1 %v1880_v4, %s2786_s21  ;;  %s2791_s21 = smov 94   ;;  %v2118_v54 = vrot.slane %v2109_v20, %v3179_v27  ;;  %v819_v4 = vadd.f32 1.0, %v2614_v49  ;;  %v2616_v6 = vpop.eup %2615 }
 0x429   : > { %v1371_v15 = vpop.permute.xlu1 %1370  ;;  %v1413_v16 = vpop.permute.xlu0 %1412  ;;  %2621 = vrcp.f32 %v819_v4 }
 0x42a   : > { %v1373_v18 = vsel %vm1372_vm14, %v1369_v44, %v1371_v15  ;;  %v1374_v19 = vsel %vm1372_vm14, %v1371_v15, %v1369_v44  ;;  %v2131_v44 = vld [vmem:[#allocation2 + $0x56] ss:$8 sm:$0x3]  ;;  %v2153_v15 = vld [vmem:[#allocation2 + $0x57] ss:$8 sm:$0x3] }
 0x42b   : > { %v1375_v21 = vadd.f32 %v1374_v19, %v1353_v11  ;;  %v1376_v22 = vadd.f32 %v1373_v18, %v1354_v12  ;;  %2101 = vrot.lane.b32.xlu0 %v2096_v62, %s2789_s17  ;;  %2057 = vrot.lane.b32.xlu1 %v2050_v10, %s2787_s18  ;;  %v2136_v53 = vrot.slane %v2131_v44, %v3181_v32  ;;  %s2794_s18 = smov 78   ;;  %vm1799_vm14 = vcmp.lt.s32.totalorder %v3256_v14, 113 }
 0x42c   : > { %v2028_v11 = vrot.slane %v2023_v2, %v3181_v32  ;;  %v2010_v12 = vrot.slane %v2001_v40, %v3179_v27  ;;  %v2158_v19 = vrot.slane %v2153_v15, %v3181_v32  ;;  %v2140_v20 = vrot.slane %v2131_v44, %v3179_v27 }
 0x42d   : > { %v1393_v59 = vpop.permute.xlu1 %1392  ;;  %v1435_v1 = vpop.permute.xlu0 %1434 }
 0x42e   : > { %v1395_v36 = vsel %vm1394_vm15, %v1391_v63, %v1393_v59  ;;  %v1396_v38 = vsel %vm1394_vm15, %v1393_v59, %v1391_v63  ;;  %vm1821_vm15 = vcmp.lt.s32.totalorder %v3256_v14, 112 }
 0x42f   : > { %v1397_v41 = vadd.f32 %v1396_v38, %v1375_v21  ;;  %v1398_v42 = vadd.f32 %v1395_v36, %v1376_v22  ;;  %2121 = vrot.lane.b32.xlu0 %v2114_v23, %s2790_s20  ;;  %2077 = vrot.lane.b32.xlu1 %v2070_v0, %s2788_s30  ;;  %v2032_v36 = vrot.slane %v2023_v2, %v3179_v27  ;;  %s2396_s30 = sshll.u32 %s436_s13, 6 }
 0x431   : > { %v1415_v28 = vpop.permute.xlu1 %1414  ;;  %v1457_v25 = vpop.permute.xlu0 %1456 }
 0x432   : > { %v1417_v37 = vsel %vm1416_vm0, %v1413_v16, %v1415_v28  ;;  %v1418_v43 = vsel %vm1416_vm0, %v1415_v28, %v1413_v16  ;;  %v2175_v16 = vld [vmem:[#allocation2 + $0x60] ss:$8 sm:$0x3]  ;;  %vm1691_vm0 = vcmp.lt.s32.totalorder %v3256_v14, 127 }
 0x433   : > { %v1419_v46 = vadd.f32 %v1418_v43, %v1397_v41  ;;  %v1420_v48 = vadd.f32 %v1417_v37, %v1398_v42  ;;  %2013 = vrot.lane.b32.xlu0 %v2006_v61, %s2791_s21  ;;  %2099 = vrot.lane.b32.xlu1 %v2092_v34, %s2789_s17  ;;  %v2162_v34 = vrot.slane %v2153_v15, %v3179_v27  ;;  %s2432_s17 = sshll.u32 %s2887_s10, 10 }
 0x435   : > { %v1437_v51 = vpop.permute.xlu1 %1436  ;;  %v1477_v52 = vpop.permute.xlu0 %1476 }
 0x436   : > { %v1439_v55 = vsel %vm1438_vm1, %v1435_v1, %v1437_v51  ;;  %v1440_v56 = vsel %vm1438_vm1, %v1437_v51, %v1435_v1  ;;  %v2184_v1 = vrot.slane %v2175_v16, %v3179_v27  ;;  %vm1713_vm1 = vcmp.lt.s32.totalorder %v3256_v14, 126 }
 0x437   : > { %v1441_v3 = vadd.f32 %v1440_v56, %v1419_v46  ;;  %v1442_v63 = vadd.f32 %v1439_v55, %v1420_v48  ;;  %2143 = vrot.lane.b32.xlu0 %v2136_v53, %s2792_s16  ;;  %2123 = vrot.lane.b32.xlu1 %v2118_v54, %s2790_s20  ;;  %v2180_v48 = vrot.slane %v2175_v16, %v3181_v32  ;;  %s438_s20 = scalar_lea.vmem [#allocation7], %s2396_s30 }
 0x439   : > { %v3341_v7 = vadd.f32 %v1441_v3, %v3283_v24  ;;  %v3344_v8 = vadd.f32 %v1442_v63, %v3285_v30  ;;  %v1459_v10 = vpop.permute.xlu1 %1458  ;;  %v1499_v58 = vpop.permute.xlu0 %1498  ;;  %v821_v30 = vadd.f32 1.0, %v2616_v6 }
 0x43a   : > { %v1461_v62 = vsel %vm1460_vm2, %v1457_v25, %v1459_v10  ;;  %v1462_v13 = vsel %vm1460_vm2, %v1459_v10, %v1457_v25  ;;  %v2618_v24 = vpop.eup %2617  ;;  %vm1735_vm2 = vcmp.lt.s32.totalorder %v3256_v14, 125 }
 0x43b   : > { %2035 = vrot.lane.b32.xlu0 %v2028_v11, %s2793_s27  ;;  %2015 = vrot.lane.b32.xlu1 %v2010_v12, %s2791_s21  ;;  %v818_v23 = vadd.f32 1.0, %v2618_v24  ;;  %2623 = vrcp.f32 %v821_v30  ;;  %v2620_v0 = vpop.eup %2619  ;;  %s2304_s21 = sshll.u32 %s438_s20, 4  ;;  %s3502_s21 = int_to_ptr.vmem [resolvable:$true] %s2304_s21 }
 0x43c   : > { %v820_v28 = vadd.f32 1.0, %v2620_v0  ;;  %v2622_v37 = vpop.eup %2621 }
 0x43d   : > { %v1479_v17 = vpop.permute.xlu1 %1478  ;;  %v1521_v18 = vpop.permute.xlu0 %1520  ;;  %2625 = vrcp.f32 %v818_v23  ;;  %v1660_v23 = vld [vmem:[#allocation2 + $0x30] ss:$8 sm:$0x3] }
 0x43e   : > { %v1481_v9 = vsel %vm1480_vm3, %v1477_v52, %v1479_v17  ;;  %v1482_v21 = vsel %vm1480_vm3, %v1479_v17, %v1477_v52  ;;  %2627 = vrcp.f32 %v820_v28  ;;  %vm1929_vm3 = vcmp.lt.s32.totalorder %v3256_v14, 98 }
 0x43f   : > { %v1483_v22 = vadd.f32 %v1482_v21, %v1462_v13  ;;  %v1484_v59 = vadd.f32 %v1481_v9, %v1461_v62  ;;  %2165 = vrot.lane.b32.xlu0 %v2158_v19, %s2794_s18  ;;  %2145 = vrot.lane.b32.xlu1 %v2140_v20, %s2792_s16  ;;  %s3500_s16 = scalar_lea.hbm %s3560_s12, %s2432_s17 }
 0x441   : > { %v1501_v31 = vpop.permute.xlu1 %1500  ;;  %v1543_v33 = vpop.permute.xlu0 %1542 }
 0x442   : > { %v1503_v38 = vsel %vm1502_vm4, %v1499_v58, %v1501_v31  ;;  %v1504_v40 = vsel %vm1502_vm4, %v1501_v31, %v1499_v58  ;;  %vm1909_vm4 = vcmp.lt.s32.totalorder %v3256_v14, 99 }
 0x443   : > { %v1505_v41 = vadd.f32 %v1504_v40, %v1483_v22  ;;  %v1506_v42 = vadd.f32 %v1503_v38, %v1484_v59  ;;  %2189 = vrot.lane.b32.xlu0 %v2184_v1, %s2795_s19  ;;  %2037 = vrot.lane.b32.xlu1 %v2032_v36, %s2793_s27  ;;  %s3506_s27 = scalar_lea.sflag [#allocation6], %s436_s13 }
 0x445   : > { %v1523_v25 = vpop.permute.xlu1 %1522  ;;  %v1565_v61 = vpop.permute.xlu0 %1564 }
 0x446   : > { %v1525_v43 = vsel %vm1524_vm5, %v1521_v18, %v1523_v25  ;;  %v1526_v44 = vsel %vm1524_vm5, %v1523_v25, %v1521_v18  ;;  %v2624_v52 = vpop.eup %2623  ;;  %vm1951_vm5 = vcmp.lt.s32.totalorder %v3256_v14, 97 }
 0x447   : > { %v1527_v45 = vadd.f32 %v1526_v44, %v1505_v41  ;;  %v1528_v46 = vadd.f32 %v1525_v43, %v1506_v42  ;;  %2237 = vperm.xlu0 %2611, %v2622_v37   ;;  %2167 = vrot.lane.b32.xlu1 %v2162_v34, %s2794_s18  ;;  %v2626_v63 = vpop.eup %2625  ;;  %v1669_v41 = vrot.slane %v1660_v23, %v3179_v27  ;;  %s2673_s18 = scalar_lea.vmem %s3502_s21, 1024 }
 0x448   : > { %v2628_v62 = vpop.eup %2627  ;;  %p2674_p6 = scmp.ne.s32.totalorder %s3502_s21, %s2673_s18 }
 0x449   : > { %v1545_v49 = vpop.permute.xlu1 %1544  ;;  %v1587_v51 = vpop.permute.xlu0 %1586 }
 0x44a   : > { %v1547_v53 = vsel %vm1546_vm6, %v1543_v33, %v1545_v49  ;;  %v1548_v54 = vsel %vm1546_vm6, %v1545_v49, %v1543_v33  ;;  %vm1973_vm6 = vcmp.lt.s32.totalorder %v3256_v14, 96  ;;  %p2675_p10 = pnand %p2674_p6, %p3574_p9 }
 0x44b   : > { %v1549_v55 = vadd.f32 %v1548_v54, %v1527_v45  ;;  %v1550_v56 = vadd.f32 %v1547_v53, %v1528_v46  ;;  %2187 = vrot.lane.b32.xlu1 %v2180_v48, %s2795_s19  ;;  %2247 = vperm.xlu0 %2611, %v2624_v52   ;;  %s2796_s19 = smov [#allocation7]  }
 0x44c   : > { %p2676_p12 = pneg %p2675_p10  ;;  %s2677_s30 = sshll.u32 %s2796_s19, 4  ;;  %s2678_s30 = int_to_ptr.vmem [resolvable:$false] %s2677_s30 }
 0x44d   : > { %v1567_v2 = vpop.permute.xlu1 %1566  ;;  %v1609_v3 = vpop.permute.xlu0 %1608  ;;  %s2679_s17 = scalar_lea.vmem %s2678_s30, 2048  ;;  %p2680_p2 = scmp.lt.s32.totalorder %s3502_s21, %s2678_s30 }
 0x44e   : > { %v1569_v4 = vsel %vm1568_vm7, %v1565_v61, %v1567_v2  ;;  %v1570_v6 = vsel %vm1568_vm7, %v1567_v2, %v1565_v61  ;;  %vm1843_vm7 = vcmp.lt.s32.totalorder %v3256_v14, 111  ;;  %p2681_p3 = scmp.lt.s32.totalorder %s2679_s17, %s2673_s18 }
 0x44f   : > { %v1571_v10 = vadd.f32 %v1570_v6, %v1549_v55  ;;  %v1572_v58 = vadd.f32 %v1569_v4, %v1550_v56  ;;  %2232 = vperm.xlu1 %2612, %v2626_v63   ;;  %v1665_v6 = vrot.slane %v1660_v23, %v3181_v32 }
 0x450   : > { %p2682_p4 = por %p2681_p3, %p2680_p2 }
 0x451   : > { %v1589_v11 = vpop.permute.xlu1 %1588  ;;  %v1629_v12 = vpop.permute.xlu0 %1628 }
 0x452   : > { %v1591_v13 = vsel %vm1590_vm8, %v1587_v51, %v1589_v11  ;;  %v1592_v15 = vsel %vm1590_vm8, %v1589_v11, %v1587_v51  ;;  %vm1995_vm8 = vcmp.lt.s32.totalorder %v3256_v14, 95  ;;  %p2683_p7 = pnand %p2682_p4, %p2676_p12 }
 0x453   : > { %v3364_v24 = vadd.f32 %v1592_v15, %v1571_v10  ;;  %v3366_v30 = vadd.f32 %v1591_v13, %v1572_v58  ;;  %2242 = vperm.xlu1 %2612, %v2628_v62  }
 0x455   : > { %v1611_v16 = vpop.permute.xlu1 %1610  ;;  %v1651_v17 = vpop.permute.xlu0 %1650 }
 0x456   : > { %v1613_v18 = vsel %vm1612_vm9, %v1609_v3, %v1611_v16  ;;  %v1614_v19 = vsel %vm1612_vm9, %v1611_v16, %v1609_v3  ;;  %vm1865_vm9 = vcmp.lt.s32.totalorder %v3256_v14, 110 }
 0x459   : > { %v1631_v20 = vpop.permute.xlu1 %1630  ;;  %v1688_v9 = vpop.permute.xlu0 %1687 }
 0x45a   : > { %v1633_v21 = vsel %vm1632_vm10, %v1629_v12, %v1631_v20  ;;  %v1634_v22 = vsel %vm1632_vm10, %v1631_v20, %v1629_v12  ;;  %vm2061_vm10 = vcmp.lt.s32.totalorder %v3256_v14, 83 }
 0x45b   : > { %v1635_v59 = vadd.f32 %v1634_v22, %v1614_v19  ;;  %v1636_v1 = vadd.f32 %v1633_v21, %v1613_v18 }
 0x45d   : > { %v1653_v0 = vpop.permute.xlu1 %1652  ;;  %v1756_v31 = vpop.permute.xlu0 %1755 }
 0x45e   : > { %v1655_v33 = vsel %vm1654_vm11, %v1651_v17, %v1653_v0  ;;  %v1656_v36 = vsel %vm1654_vm11, %v1653_v0, %v1651_v17  ;;  %vm2081_vm11 = vcmp.lt.s32.totalorder %v3256_v14, 82 }
 0x45f   : > { %v1657_v38 = vadd.f32 %v1656_v36, %v1635_v59  ;;  %v1658_v40 = vadd.f32 %v1655_v33, %v1636_v1 }
 0x461   : > { %v1754_v42 = vpop.permute.xlu1 %1753  ;;  %v1776_v28 = vpop.permute.xlu0 %1775  ;;  %v1673_v25 = vadd.f32 %v1669_v41, %v1658_v40  ;;  %v1672_v58 = vadd.f32 %v1665_v6, %v1657_v38 }
 0x462   : > { %v1758_v61 = vsel %vm1757_vm12, %v1754_v42, %v1756_v31  ;;  %v1759_v34 = vsel %vm1757_vm12, %v1756_v31, %v1754_v42  ;;  %vm1887_vm12 = vcmp.lt.s32.totalorder %v3256_v14, 109 }
 0x465   : > { %v1774_v37 = vpop.permute.xlu1 %1773  ;;  %v1798_v43 = vpop.permute.xlu0 %1797 }
 0x466   : > { %v1778_v44 = vsel %vm1777_vm13, %v1774_v37, %v1776_v28  ;;  %v1779_v45 = vsel %vm1777_vm13, %v1776_v28, %v1774_v37  ;;  %vm2103_vm13 = vcmp.lt.s32.totalorder %v3256_v14, 81 }
 0x467   : > { %v1780_v46 = vadd.f32 %v1778_v44, %v1758_v61  ;;  %v1781_v48 = vadd.f32 %v1779_v45, %v1759_v34 }
 0x469   : > { %v1796_v49 = vpop.permute.xlu1 %1795  ;;  %v1820_v51 = vpop.permute.xlu0 %1819 }
 0x46a   : > { %v1800_v52 = vsel %vm1799_vm14, %v1796_v49, %v1798_v43  ;;  %v1801_v53 = vsel %vm1799_vm14, %v1798_v43, %v1796_v49  ;;  %vm2125_vm14 = vcmp.lt.s32.totalorder %v3256_v14, 80 }
 0x46b   : > { %v1802_v27 = vadd.f32 %v1800_v52, %v1780_v46  ;;  %v1803_v54 = vadd.f32 %v1801_v53, %v1781_v48 }
 0x46d   : > { %v1818_v55 = vpop.permute.xlu1 %1817  ;;  %v1710_v56 = vpop.permute.xlu0 %1709 }
 0x46e   : > { %v1822_v2 = vsel %vm1821_vm15, %v1818_v55, %v1820_v51  ;;  %v1823_v3 = vsel %vm1821_vm15, %v1820_v51, %v1818_v55  ;;  %vm2017_vm15 = vcmp.lt.s32.totalorder %v3256_v14, 94 }
 0x46f   : > { %v3376_v63 = vadd.f32 %v1822_v2, %v1802_v27  ;;  %v3378_v4 = vadd.f32 %v1823_v3, %v1803_v54 }
 0x471   : > { %v1690_v10 = vpop.permute.xlu1 %1689  ;;  %v1732_v11 = vpop.permute.xlu0 %1731 }
 0x472   : > { %v1692_v12 = vsel %vm1691_vm0, %v1688_v9, %v1690_v10  ;;  %v1693_v62 = vsel %vm1691_vm0, %v1690_v10, %v1688_v9  ;;  %vm2147_vm0 = vcmp.lt.s32.totalorder %v3256_v14, 79 }
 0x473   : > { %v1694_v13 = vadd.f32 %v1692_v12, %v1672_v58  ;;  %v1695_v15 = vadd.f32 %v1693_v62, %v1673_v25 }
 0x475   : > { %v1712_v16 = vpop.permute.xlu1 %1711  ;;  %v1908_v17 = vpop.permute.xlu0 %1907 }
 0x476   : > { %v1714_v18 = vsel %vm1713_vm1, %v1710_v56, %v1712_v16  ;;  %v1715_v19 = vsel %vm1713_vm1, %v1712_v16, %v1710_v56  ;;  %vm2039_vm1 = vcmp.lt.s32.totalorder %v3256_v14, 93 }
 0x477   : > { %v1716_v20 = vadd.f32 %v1714_v18, %v1694_v13  ;;  %v1717_v21 = vadd.f32 %v1715_v19, %v1695_v15 }
 0x479   : > { %v1734_v22 = vpop.permute.xlu1 %1733  ;;  %v1928_v59 = vpop.permute.xlu0 %1927 }
 0x47a   : > { %v1736_v1 = vsel %vm1735_vm2, %v1732_v11, %v1734_v22  ;;  %v1737_v23 = vsel %vm1735_vm2, %v1734_v22, %v1732_v11  ;;  %vm2169_vm2 = vcmp.lt.s32.totalorder %v3256_v14, 78 }
 0x47b   : > { %v1738_v0 = vadd.f32 %v1736_v1, %v1716_v20  ;;  %v1739_v31 = vadd.f32 %v1737_v23, %v1717_v21 }
 0x47d   : > { %v2198_v9 = vadd.f32 %v1738_v0, %v3364_v24  ;;  %v2199_v33 = vadd.f32 %v1739_v31, %v3366_v30  ;;  %v1906_v36 = vpop.permute.xlu1 %1905  ;;  %v1950_v38 = vpop.permute.xlu0 %1949 }
 0x47e   : > { %v1910_v3 = vsel %vm1909_vm4, %v1906_v36, %v1908_v17  ;;  %v1911_v6 = vsel %vm1909_vm4, %v1908_v17, %v1906_v36 }
 0x47f   : > { %v3387_v40 = vadd.f32 %v2198_v9, %v3341_v7  ;;  %v3390_v41 = vadd.f32 %v2199_v33, %v3344_v8 }
 0x481   : > { %v1926_v42 = vpop.permute.xlu1 %1925  ;;  %v1972_v28 = vpop.permute.xlu0 %1971 }
 0x482   : > { %v1930_v55 = vsel %vm1929_vm3, %v1926_v42, %v1928_v59  ;;  %v1931_v56 = vsel %vm1929_vm3, %v1928_v59, %v1926_v42  ;;  %vm2191_vm3 = vcmp.lt.s32.totalorder %v3256_v14, 77 }
 0x483   : > { %v1932_v11 = vadd.f32 %v1930_v55, %v1910_v3  ;;  %v1933_v12 = vadd.f32 %v1931_v56, %v1911_v6 }
 0x485   : > { %v1948_v25 = vpop.permute.xlu1 %1947  ;;  %v1840_v61 = vpop.permute.xlu0 %1839 }
 0x486   : > { %v1952_v10 = vsel %vm1951_vm5, %v1948_v25, %v1950_v38  ;;  %v1953_v58 = vsel %vm1951_vm5, %v1950_v38, %v1948_v25 }
 0x487   : > { %v1954_v16 = vadd.f32 %v1952_v10, %v1932_v11  ;;  %v1955_v18 = vadd.f32 %v1953_v58, %v1933_v12 }
 0x489   : > { %v1970_v34 = vpop.permute.xlu1 %1969  ;;  %v1992_v37 = vpop.permute.xlu0 %1991 }
 0x48a   : > { %v1974_v13 = vsel %vm1973_vm6, %v1970_v34, %v1972_v28  ;;  %v1975_v15 = vsel %vm1973_vm6, %v1972_v28, %v1970_v34 }
 0x48b   : > { %v1976_v20 = vadd.f32 %v1974_v13, %v1954_v16  ;;  %v1977_v21 = vadd.f32 %v1975_v15, %v1955_v18 }
 0x48d   : > { %v1842_v43 = vpop.permute.xlu1 %1841  ;;  %v1862_v44 = vpop.permute.xlu0 %1861 }
 0x48e   : > { %v1844_v17 = vsel %vm1843_vm7, %v1840_v61, %v1842_v43  ;;  %v1845_v19 = vsel %vm1843_vm7, %v1842_v43, %v1840_v61 }
 0x48f   : > { %v1846_v9 = vadd.f32 %v1844_v17, %v3376_v63  ;;  %v1847_v33 = vadd.f32 %v1845_v19, %v3378_v4 }
 0x491   : > { %v1994_v45 = vpop.permute.xlu1 %1993  ;;  %v3392_v24 = vpop.permute.xlu0 %1883 }
 0x492   : > { %v1996_v1 = vsel %vm1995_vm8, %v1992_v37, %v1994_v45  ;;  %v1997_v23 = vsel %vm1995_vm8, %v1994_v45, %v1992_v37 }
 0x493   : > { %v1998_v4 = vadd.f32 %v1996_v1, %v1976_v20  ;;  %v1999_v61 = vadd.f32 %v1997_v23, %v1977_v21 }
 0x495   : > { %v1864_v30 = vpop.permute.xlu1 %1863  ;;  %v2060_v46 = vpop.permute.xlu0 %2059 }
 0x496   : > { %v1866_v36 = vsel %vm1865_vm9, %v1862_v44, %v1864_v30  ;;  %v1867_v38 = vsel %vm1865_vm9, %v1864_v30, %v1862_v44 }
 0x499   : > { %v3394_v48 = vpop.permute.xlu1 %1885  ;;  %v2080_v7 = vpop.permute.xlu0 %2079 }
 0x49a   : > { %v1888_v11 = vsel %vm1887_vm12, %v3392_v24, %v3394_v48 }
 0x49d   : > { %v2058_v49 = vpop.permute.xlu1 %2057  ;;  %v2102_v51 = vpop.permute.xlu0 %2101 }
 0x49e   : > { %v2062_v42 = vsel %vm2061_vm10, %v2058_v49, %v2060_v46  ;;  %v2063_v28 = vsel %vm2061_vm10, %v2060_v46, %v2058_v49  ;;  %v1869_v49 = vadd.f32 %v1867_v38, %v1847_v33 }
 0x4a1   : > { %v2078_v8 = vpop.permute.xlu1 %2077  ;;  %v2122_v52 = vpop.permute.xlu0 %2121 }
 0x4a2   : > { %v2082_v0 = vsel %vm2081_vm11, %v2078_v8, %v2080_v7  ;;  %v2083_v31 = vsel %vm2081_vm11, %v2080_v7, %v2078_v8  ;;  %v1868_v7 = vadd.f32 %v1866_v36, %v1846_v9  ;;  %v2217_v36 = vrot.slane %v3249_v5, %v3181_v32 }
 0x4a3   : > { %v2084_v34 = vadd.f32 %v2082_v0, %v2062_v42  ;;  %v2085_v37 = vadd.f32 %v2083_v31, %v2063_v28 }
 0x4a4   : > { %v1890_v19 = vadd.f32 %v1888_v11, %v1868_v7  ;;  %v2643_v11 = vld [vmem:[%s2997_s22 + $0x20] sm:$0xff] }
 0x4a5   : > { %v2100_v53 = vpop.permute.xlu1 %2099  ;;  %v2014_v27 = vpop.permute.xlu0 %2013 }
 0x4a6   : > { %v2104_v25 = vsel %vm2103_vm13, %v2100_v53, %v2102_v51  ;;  %v2105_v63 = vsel %vm2103_vm13, %v2102_v51, %v2100_v53 }
 0x4a7   : > { %v2106_v51 = vadd.f32 %v2104_v25, %v2084_v34  ;;  %v2107_v8 = vadd.f32 %v2105_v63, %v2085_v37 }
 0x4a9   : > { %v2124_v54 = vpop.permute.xlu1 %2123  ;;  %v2144_v2 = vpop.permute.xlu0 %2143 }
 0x4aa   : > { %v2126_v44 = vsel %vm2125_vm14, %v2122_v52, %v2124_v54  ;;  %v2127_v45 = vsel %vm2125_vm14, %v2124_v54, %v2122_v52 }
 0x4ab   : > { %v2128_v3 = vadd.f32 %v2126_v44, %v2106_v51  ;;  %v2129_v6 = vadd.f32 %v2127_v45, %v2107_v8 }
 0x4ad   : > { %v2016_v62 = vpop.permute.xlu1 %2015  ;;  %v2036_v22 = vpop.permute.xlu0 %2035 }
 0x4ae   : > { %v2018_v30 = vsel %vm2017_vm15, %v2014_v27, %v2016_v62  ;;  %v2019_v46 = vsel %vm2017_vm15, %v2016_v62, %v2014_v27 }
 0x4af   : > { %v2020_v27 = vadd.f32 %v2018_v30, %v1998_v4  ;;  %v2021_v10 = vadd.f32 %v2019_v46, %v1999_v61  ;;  %v2637_v46 = vld [vmem:[%s2997_s22 + $0x10] sm:$0xff] }
 0x4b1   : > { %v2146_v59 = vpop.permute.xlu1 %2145  ;;  %v2166_v53 = vpop.permute.xlu0 %2165 }
 0x4b2   : > { %v2148_v55 = vsel %vm2147_vm0, %v2144_v2, %v2146_v59  ;;  %v2149_v56 = vsel %vm2147_vm0, %v2146_v59, %v2144_v2  ;;  %v1889_v2 = vsel %vm1887_vm12, %v3394_v48, %v3392_v24 }
 0x4b3   : > { %v2150_v13 = vadd.f32 %v2148_v55, %v2128_v3  ;;  %v2151_v15 = vadd.f32 %v2149_v56, %v2129_v6  ;;  %v1891_v20 = vadd.f32 %v1889_v2, %v1869_v49  ;;  %v2638_v49 = vld [vmem:[%s2997_s22 + $0x18] sm:$0xff]  ;;  %v2639_v55 = vld [vmem:[%s2997_s22 + $0x30] sm:$0xff]  ;;  %v2641_v3 = vld [vmem:[%s2997_s22] sm:$0xff] }
 0x4b5   : > { %v2038_v43 = vpop.permute.xlu1 %2037  ;;  %v2190_v17 = vpop.permute.xlu0 %2189 }
 0x4b6   : > { %v2040_v52 = vsel %vm2039_vm1, %v2036_v22, %v2038_v43  ;;  %v2041_v54 = vsel %vm2039_vm1, %v2038_v43, %v2036_v22 }
 0x4b7   : > { %v2042_v16 = vadd.f32 %v2040_v52, %v2020_v27  ;;  %v2043_v18 = vadd.f32 %v2041_v54, %v2021_v10  ;;  %v2640_v52 = vld [vmem:[%s2997_s22 + $0x38] sm:$0xff]  ;;  %v2642_v10 = vld [vmem:[%s2997_s22 + $0x8] sm:$0xff] }
 0x4b9   : > { %v2168_v58 = vpop.permute.xlu1 %2167  ;;  %v2202_v48 = vadd.f32 %v2042_v16, %v1890_v19  ;;  %v2203_v23 = vadd.f32 %v2043_v18, %v1891_v20 }
 0x4ba   : > { %v2170_v12 = vsel %vm2169_vm2, %v2166_v53, %v2168_v58  ;;  %v2171_v62 = vsel %vm2169_vm2, %v2168_v58, %v2166_v53 }
 0x4bb   : > { %v2172_v21 = vadd.f32 %v2170_v12, %v2150_v13  ;;  %v2173_v22 = vadd.f32 %v2171_v62, %v2151_v15  ;;  %v2644_v12 = vld [vmem:[%s2997_s22 + $0x28] sm:$0xff] }
 0x4bd   : > { %v2188_v59 = vpop.permute.xlu1 %2187 }
 0x4be   : > { %v2192_v1 = vsel %vm2191_vm3, %v2188_v59, %v2190_v17  ;;  %v2193_v24 = vsel %vm2191_vm3, %v2190_v17, %v2188_v59 }
 0x4bf   : > { %v2194_v0 = vadd.f32 %v2192_v1, %v2172_v21  ;;  %v2195_v31 = vadd.f32 %v2193_v24, %v2173_v22 }
 0x4c1   : > { %v2204_v9 = vadd.f32 %v2202_v48, %v2194_v0  ;;  %v2205_v33 = vadd.f32 %v2203_v23, %v2195_v31 }
 0x4c3   : > { %v2206_v38 = vadd.f32 %v2204_v9, %v3387_v40  ;;  %v2207_v42 = vadd.f32 %v2205_v33, %v3390_v41 }
 0x4c5   : > { %v2218_v28 = vadd.f32 %v2217_v36, %v2206_v38  ;;  %v2219_v25 = vadd.f32 %v2217_v36, %v2207_v42 }
 0x4c6   : > { %v2238_v40 = vpop.permute.xlu0 %2237 }
 0x4c7   : > { %v2220_v63 = vsub.f32 0.0, %v2218_v28  ;;  %v2221_v14 = vsub.f32 0.0, %v2219_v25  ;;  %v2252_v7 = vmul.f32 %v2637_v46, %v2238_v40  ;;  %v2253_v51 = vmul.f32 %v2638_v49, %v2238_v40 }
 0x4c9   : > { %v2222_v4 = vmul.f32 1.442695, %v2220_v63  ;;  %v2224_v61 = vmul.f32 1.442695, %v2221_v14 }
 0x4ca   : > { %v2248_v44 = vpop.permute.xlu0 %2247 }
 0x4cb   : > { %2629 = vpow2.f32 %v2222_v4  ;;  %v2256_v56 = vmul.f32 %v2639_v55, %v2248_v44  ;;  %v2257_v54 = vmul.f32 %v2640_v52, %v2248_v44 }
 0x4cc   : > { %2631 = vpow2.f32 %v2224_v61 }
 0x4ce   : > { %v2233_v41 = vpop.permute.xlu1 %2232 }
 0x4cf   : > { %v2250_v6 = vmul.f32 %v2641_v3, %v2233_v41  ;;  %v2251_v58 = vmul.f32 %v2642_v10, %v2233_v41 }
 0x4d2   : > { %v2243_v45 = vpop.permute.xlu1 %2242 }
 0x4d3   : > { %v2254_v2 = vmul.f32 %v2643_v11, %v2243_v45  ;;  %v2255_v62 = vmul.f32 %v2644_v12, %v2243_v45 }
 0x4d5   : > { %v2630_v34 = vpop.eup %2629 }
 0x4d6   : > { %v2632_v37 = vpop.eup %2631  ;;  %v2226_v43 = vadd.f32 1.0, %v2630_v34 }
 0x4d7   : > { %v2227_v5 = vadd.f32 1.0, %v2632_v37 }
 0x4d8   : > { %2633 = vrcp.f32 %v2226_v43 }
 0x4d9   : > { %2635 = vrcp.f32 %v2227_v5 }
 0x4e2   : > { %v2634_v30 = vpop.eup %2633 }
 0x4e3   : > { %v2636_v8 = vpop.eup %2635  ;;  %v2261_v53 = vrot.slane %v2634_v30, %v3181_v32 }
 0x4e4   : > { %v2265_v27 = vrot.slane %v2636_v8, %v3181_v32 }
 0x4e5   : > { %v2268_v13 = vmul.f32 %v2261_v53, %v3016_v35  ;;  %v2272_v15 = vmul.f32 %v2261_v53, %v3048_v57  ;;  %v2266_v16 = vmul.f32 %v2261_v53, %v3002_v26  ;;  %v2270_v18 = vmul.f32 %v2261_v53, %v3034_v47 }
 0x4e6   : > { %v2269_v17 = vmul.f32 %v2265_v27, %v3021_v39  ;;  %v2273_v32 = vmul.f32 %v2265_v27, %v3053_v60  ;;  %v2267_v19 = vmul.f32 %v2265_v27, %v3007_v29  ;;  %v2271_v20 = vmul.f32 %v2265_v27, %v3039_v50 }
 0x4e7   : > { %v2276_v21 = vadd.f32 %v2268_v13, %v2252_v7  ;;  %v2280_v22 = vadd.f32 %v2272_v15, %v2256_v56  ;;  %v2274_v59 = vadd.f32 %v2266_v16, %v2250_v6  ;;  %v2278_v35 = vadd.f32 %v2270_v18, %v2254_v2 }
 0x4e8   : > { %v2277_v26 = vadd.f32 %v2269_v17, %v2253_v51  ;;  %v2281_v47 = vadd.f32 %v2273_v32, %v2257_v54  ;;  %v2275_v39 = vadd.f32 %v2267_v19, %v2251_v58  ;;  %v2279_v57 = vadd.f32 %v2271_v20, %v2255_v62 }
 0x4e9   : > { %2284 = vst [vmem:[%s438_s20 + $0x10] sm:$0xff] %v2276_v21  ;;  %2288 = vst [vmem:[%s438_s20 + $0x30] sm:$0xff] %v2280_v22 }
 0x4ea   : > { %2282 = vst [vmem:[%s438_s20] sm:$0xff] %v2274_v59  ;;  %2286 = vst [vmem:[%s438_s20 + $0x20] sm:$0xff] %v2278_v35 }
 0x4eb   : > { %2285 = vst [vmem:[%s438_s20 + $0x18] sm:$0xff] %v2277_v26  ;;  %2289 = vst [vmem:[%s438_s20 + $0x38] sm:$0xff] %v2281_v47 }
 0x4ec   : > { %2283 = vst [vmem:[%s438_s20 + $0x8] sm:$0xff] %v2275_v39  ;;  %2287 = vst [vmem:[%s438_s20 + $0x28] sm:$0xff] %v2279_v57 }
 0x4ed   : > { %2686 = shalt.err (!%p2683_p7)
}
 0x4ee   : > { %s2687_s13 = scalar_lea.hbm %s3500_s16, 1024  ;;  %s2691_s22 = scalar_lea.hbm %s3560_s12, 2048 }
 0x4ef   : > { %p2688_p8 = scmp.ne.s32.totalorder %s3500_s16, %s2687_s13  ;;  %p2692_p1 = scmp.lt.u32.totalorder %s3500_s16, %s3560_s12 }
 0x4f0   : > { %p2693_p0 = scmp.lt.u32.totalorder %s2691_s22, %s2687_s13  ;;  %p2695_p6 = scmp.lt.u32.totalorder %s2687_s13, %s3500_s16 }
 0x4f1   : > { %p2689_p11 = pnand %p2688_p8, %p3574_p9 }
 0x4f2   : > { %p2694_p5 = por %p2693_p0, %p2692_p1 }
 0x4f3   : > { %p2690_p13 = pneg %p2689_p11 }
 0x4f4   : > { %p2696_p10 = por %p2695_p6, %p2694_p5 }
 0x4f6   : > { %p2697_p12 = pnand %p2696_p10, %p2690_p13 }
 0x4f8   : > { %2700 = shalt.err (!%p2697_p12)
}
 0x4f9   : > { %s2797_s18 = smov 256  }
 0x4fa   : > { %2510 = dma.vmem_to_hbm [thread:$0]  (%p3574_p9), %s3502_s21, 1024, %s3500_s16, %s3506_s27, %s2797_s18, %s2797_s18, %s2765_s29  }
 0x4fb PF: > { %p2522_p2 = scmp.ge.s32.totalorder %s2739_s26, 2  ;;  %s2319_s17 = sand.u32 1, %s2727_s23  }
 0x4fc   : > { %p3575_p3 = scmp.ne.s32.totalorder %s3567_s15, 0  ;;  %s2320_s13 = scalar_lea.sflag [#allocation6], %s2319_s17 }
 0x4fe   : > { %p2517_p4 = pnand %p2522_p2, %p3575_p3 }
 0x500   : > { %2722 = dma.done.wait (!%p2517_p4), %s2320_s13, 1024  }
 0x501   : > { %2724 = vsyncadd (!%p2517_p4), %s2320_s13, 4294966272  ;;  %s3576_s14 = sld [smem:[#allocation10_spill]]  ;;  %p25_p7 = scmp.ge.s32.totalorder %s2891_s28, 4  }
 0x502   : > { %s3577_s23 = smov %s2731_s24  ;;  %s3578_s24 = smov %s2735_s25 }
 0x503   : > { %s3580_s26 = smov %s2891_s28  ;;  %27 = sbr.rel (!%p25_p7) target bundleno = 7 (0x7), region = 159 }
 0x507   : > { %s3579_s25 = smov %s3576_s14 }
 0x50a   :  { %2325 = vsyncpa [#allocation5], 1 }
 0x50b   :  { %2327 = vsyncpa [#allocation5 + $0x1], 1 }
 0x50c   :  { %2328 = vsyncpa [#allocation6], 1 }
 0x50d   :  { %2330 = vsyncpa [#allocation6 + $0x1], 1 }

</bundles_post_ra>
